<compile_context>
chip_gen: v7x
topology: tpu7x:2x2x1
jax: 0.10.0
libtpu: 0.0.40
codegen_flags: <defaults>
</compile_context>

<pallas_src>
import functools

import jax
import jax.numpy as jnp
import numpy as np
from jax.experimental import pallas as pl
from jax.experimental.pallas import tpu as pltpu

GN_EPS = 1e-5
NUM_GROUPS = 32


# --------------------------------------------------------------------------- #
# Pass 1: GroupNorm statistics -> per-channel scale/shift
# --------------------------------------------------------------------------- #
def _stats_kernel(x_ref, gamma_ref, beta_ref, gmap_ref, gmapT_ref,
                  scale_ref, shift_ref, sum_acc, sq_acc, *, inv_n):
    # x_ref:      (1, Cin, TH*W)  one spatial tile, channel-major, lane-dense
    # gamma/beta: (Cin, 1)
    # gmap:       (Cin, G) one-hot channel->group;  gmapT: (G, Cin)
    # scale/shift outputs: (1, Cin, 1)   (written once, at the last tile)
    h = pl.program_id(1)

    @pl.when(h == 0)
    def _():
        sum_acc[...] = jnp.zeros_like(sum_acc)
        sq_acc[...] = jnp.zeros_like(sq_acc)

    xt = x_ref[0].astype(jnp.float32)                        # (Cin, TH*W)
    sum_acc[...] += jnp.sum(xt, axis=1, keepdims=True)       # exact f32 sums
    sq_acc[...] += jnp.sum(xt * xt, axis=1, keepdims=True)

    # Tiny group<->channel matmuls (merged: one forward, one back-map).  Hoisted
    # out of pl.when; only the final tile's result is stored below.
    sums_c = jnp.concatenate([sum_acc[...], sq_acc[...]], axis=1)        # (Cin, 2)
    sums_g = jnp.dot(gmapT_ref[...], sums_c,
                     preferred_element_type=jnp.float32) * inv_n         # (G, 2)
    mean_g = sums_g[:, 0:1]
    var_g = sums_g[:, 1:2] - mean_g * mean_g
    inv_g = jax.lax.rsqrt(var_g + GN_EPS)
    stats_c = jnp.dot(gmap_ref[...],
                      jnp.concatenate([mean_g, inv_g], axis=1),
                      preferred_element_type=jnp.float32)                # (Cin, 2)
    scale_c = stats_c[:, 1:2] * gamma_ref[...]                           # inv*gamma
    shift_c = beta_ref[...] - stats_c[:, 0:1] * scale_c                  # beta - mean*scale

    @pl.when(h == pl.num_programs(1) - 1)
    def _():
        scale_ref[0] = scale_c
        shift_ref[0] = shift_c


# --------------------------------------------------------------------------- #
# Pass 2: apply GroupNorm + SiLU + 3x3 conv on halo-padded spatial tiles
# --------------------------------------------------------------------------- #
def _apply_kernel(x_ref, top_ref, bot_ref, scale_ref, shift_ref,
                  w_ref, b_ref, mask_ref, o_ref, *, W, TH):
    # x_ref:    (1, Cin, TH*W)   tile rows [h*TH, (h+1)*TH)
    # top/bot:  (1, 1, Cin, W)   row above / below the tile (zeros off-image)
    # scale/shift: (1, Cin, 1)   precomputed GroupNorm affine
    # w_ref:    (9*CPAD, Cin)    tap-packed conv weights, bf16
    # b_ref:    (Cout, 1)
    # mask_ref: (2, TH*W)        [left-edge-valid, right-edge-valid], bf16
    # o_ref:    (1, Cout, TH*W)
    Cout = o_ref.shape[1]
    CPAD = w_ref.shape[0] // 9
    THW = TH * W
    L = (TH + 2) * W
    h = pl.program_id(1)
    nh = pl.num_programs(1)

    scale = scale_ref[0]                                      # (Cin, 1) f32
    shift = shift_ref[0]

    def gn_silu(v_f32):                                       # f32 in -> bf16 out
        vn = (v_f32 * scale + shift).astype(jnp.bfloat16)
        return vn * jax.nn.sigmoid(vn)

    xa_mid = gn_silu(x_ref[0].astype(jnp.float32))            # (Cin, TH*W) bf16
    xa_top = gn_silu(top_ref[0, 0].astype(jnp.float32))       # (Cin, W)    bf16
    xa_bot = gn_silu(bot_ref[0, 0].astype(jnp.float32))

    # Conv zero-pads *activations*: halo rows outside the image must be 0 AFTER
    # GroupNorm+SiLU, so gate them with a scalar flag.
    top_keep = jnp.where(h > 0, 1.0, 0.0).astype(jnp.bfloat16)
    bot_keep = jnp.where(h < nh - 1, 1.0, 0.0).astype(jnp.bfloat16)
    xa_top = xa_top * top_keep
    xa_bot = xa_bot * bot_keep

    xa = jnp.concatenate([xa_top, xa_mid, xa_bot], axis=1)    # (Cin, (TH+2)*W) bf16

    # One tap-packed bf16 MXU matmul, f32 accumulate:
    #   y[t*CPAD + co, p] = sum_ci w[co, ci, dy, dx] * xa[ci, p],  t = dy*3 + dx
    y = jnp.dot(w_ref[...], xa, preferred_element_type=jnp.float32)  # (9*CPAD, L)

    def tap_window(t, s):
        # Window of length TH*W starting at padded-flat offset W + s for tap t.
        yt = y[t * CPAD:(t + 1) * CPAD, :]
        start = W + s
        if 0 <= start and start + THW <= L:
            return yt[:, start:start + THW]
        # Only the two corner taps over/underhang by one element; those positions
        # are zeroed by the column masks, so a cheap wrap-around window is fine.
        k = start % L
        rolled = jnp.concatenate([yt[:, k:], yt[:, :k]], axis=1)
        return rolled[:, :THW]

    acc = tap_window(4, 0)                      # center tap (dy=1, dx=1): no roll/mask
    for dy in range(3):
        for dx in range(3):
            if dy == 1 and dx == 1:
                continue
            s = (dy - 1) * W + (dx - 1)
            yt = tap_window(dy * 3 + dx, s)
            if dx == 0:                         # needs source col-1: invalid at col 0
                yt = yt * mask_ref[0:1, :]
            elif dx == 2:                       # needs source col+1: invalid at col W-1
                yt = yt * mask_ref[1:2, :]
            acc = acc + yt                      # dy direction handled exactly by halo

    o_ref[0] = (acc[:Cout, :] + b_ref[...]).astype(o_ref.dtype)


# --------------------------------------------------------------------------- #
# Wrapper
# --------------------------------------------------------------------------- #
def _pick_tile_rows(H, W):
    """Largest TH < H dividing H with (TH*W) % 128 == 0 and TH*W <= 4096.

    Falls back to TH = H (whole image) when no such divisor exists; then the
    block equals the full array dims, which is always legal.
    """
    best = None
    for th in range(1, H):
        if H % th == 0 and (th * W) % 128 == 0 and th * W <= 4096:
            best = th
    return best if best is not None else H


@jax.jit
def unet_output_layer(x_nchw, gamma, beta, conv_w, conv_b):
    """UNET_OutputLayer forward: (B, Cin, H, W) -> (B, Cout, H, W)."""
    B, Cin, H, W = x_nchw.shape
    Cout = conv_w.shape[0]
    G = NUM_GROUPS
    assert Cin % G == 0
    HW = H * W
    TH = _pick_tile_rows(H, W)
    NH = H // TH
    THW = TH * W
    CPAD = -(-Cout // 8) * 8                  # pad Cout to a sublane multiple

    # Channel-major flat spatial view: a free reshape of contiguous NCHW.
    x = x_nchw.reshape(B, Cin, HW)

    # Halo rows for each spatial tile: (B, NH, Cin, W), zeros off the image.
    zrow = jnp.zeros((B, Cin, W), x_nchw.dtype)
    top = jnp.stack(
        [zrow if h == 0 else x_nchw[:, :, h * TH - 1, :] for h in range(NH)], axis=1)
    bot = jnp.stack(
        [zrow if h == NH - 1 else x_nchw[:, :, (h + 1) * TH, :] for h in range(NH)],
        axis=1)

    # One-hot channel<->group maps.
    ch_groups = np.arange(Cin) // (Cin // G)
    gmap_np = np.eye(G, dtype=np.float32)[ch_groups]                  # (Cin, G)
    gmap = jnp.asarray(gmap_np)
    gmapT = jnp.asarray(np.ascontiguousarray(gmap_np.T))              # (G, Cin)

    gamma2 = gamma.reshape(Cin, 1).astype(jnp.float32)
    beta2 = beta.reshape(Cin, 1).astype(jnp.float32)

    # Tap-packed conv weights: (Cout, Cin, 3, 3) -> (9*CPAD, Cin), bf16 for the MXU.
    w_t = jnp.transpose(conv_w, (2, 3, 0, 1)).reshape(9, Cout, Cin)
    w_k = jnp.pad(w_t, ((0, 0), (0, CPAD - Cout), (0, 0))) \
             .reshape(9 * CPAD, Cin).astype(jnp.bfloat16)
    b_k = conv_b.reshape(Cout, 1).astype(jnp.float32)

    # Column-edge validity masks over one tile (identical for all tiles), bf16.
    cols = np.arange(THW) % W
    masks_np = np.stack([(cols != 0), (cols != W - 1)]).astype(np.float32)
    masks = jnp.asarray(masks_np, dtype=jnp.bfloat16)                 # (2, THW)

    vmem_limit = 32 * 1024 * 1024 if NH > 1 else 56 * 1024 * 1024
    inv_n = 1.0 / float((Cin // G) * HW)

    # ---------------- Pass 1: stats ----------------
    scale_c, shift_c = pl.pallas_call(
        functools.partial(_stats_kernel, inv_n=inv_n),
        out_shape=(jax.ShapeDtypeStruct((B, Cin, 1), jnp.float32),
                   jax.ShapeDtypeStruct((B, Cin, 1), jnp.float32)),
        grid_spec=pltpu.PrefetchScalarGridSpec(
            num_scalar_prefetch=0,
            grid=(B, NH),
            in_specs=[
                pl.BlockSpec((1, Cin, THW), lambda b, h: (b, 0, h)),
                pl.BlockSpec((Cin, 1), lambda b, h: (0, 0)),
                pl.BlockSpec((Cin, 1), lambda b, h: (0, 0)),
                pl.BlockSpec((Cin, G), lambda b, h: (0, 0)),
                pl.BlockSpec((G, Cin), lambda b, h: (0, 0)),
            ],
            out_specs=(
                pl.BlockSpec((1, Cin, 1), lambda b, h: (b, 0, 0)),
                pl.BlockSpec((1, Cin, 1), lambda b, h: (b, 0, 0)),
            ),
            scratch_shapes=[pltpu.VMEM((Cin, 1), jnp.float32),
                            pltpu.VMEM((Cin, 1), jnp.float32)],
        ),
        compiler_params=pltpu.CompilerParams(
            dimension_semantics=("parallel", "arbitrary"),
            vmem_limit_bytes=vmem_limit),
        cost_estimate=pl.CostEstimate(
            flops=4 * B * Cin * HW,
            transcendentals=B * G,
            bytes_accessed=4 * B * Cin * HW + 8 * B * Cin),
    )(x, gamma2, beta2, gmap, gmapT)

    # ---------------- Pass 2: apply (GN + SiLU + conv) ----------------
    out_flat = pl.pallas_call(
        functools.partial(_apply_kernel, W=W, TH=TH),
        out_shape=jax.ShapeDtypeStruct((B, Cout, HW), x_nchw.dtype),
        grid_spec=pltpu.PrefetchScalarGridSpec(
            num_scalar_prefetch=0,
            grid=(B, NH),
            in_specs=[
                pl.BlockSpec((1, Cin, THW), lambda b, h: (b, 0, h)),
                pl.BlockSpec((1, 1, Cin, W), lambda b, h: (b, h, 0, 0)),
                pl.BlockSpec((1, 1, Cin, W), lambda b, h: (b, h, 0, 0)),
                pl.BlockSpec((1, Cin, 1), lambda b, h: (b, 0, 0)),
                pl.BlockSpec((1, Cin, 1), lambda b, h: (b, 0, 0)),
                pl.BlockSpec((9 * CPAD, Cin), lambda b, h: (0, 0)),
                pl.BlockSpec((Cout, 1), lambda b, h: (0, 0)),
                pl.BlockSpec((2, THW), lambda b, h: (0, 0)),
            ],
            out_specs=pl.BlockSpec((1, Cout, THW), lambda b, h: (b, 0, h)),
        ),
        compiler_params=pltpu.CompilerParams(
            dimension_semantics=("parallel", "parallel"),
            vmem_limit_bytes=vmem_limit),
        cost_estimate=pl.CostEstimate(
            flops=2 * 9 * CPAD * Cin * B * HW,
            transcendentals=B * Cin * (H + 2 * NH) * W,
            bytes_accessed=(4 * B * Cin * HW + 4 * B * Cout * HW
                            + 2 * 9 * CPAD * Cin + 8 * B * Cin
                            + 4 * 2 * B * NH * Cin * W)),
    )(x, top, bot, scale_c, shift_c, w_k, b_k, masks)

    # (B, Cout, H*W) -> (B, Cout, H, W): free metadata reshape, already NCHW.
    return out_flat.reshape(B, Cout, H, W)


# --------------------------------------------------------------------------- #
# Pure-JAX reference matching the PyTorch module
# --------------------------------------------------------------------------- #
def reference(x_nchw, gamma, beta, conv_w, conv_b):
    B, C, H, W = x_nchw.shape
    G = NUM_GROUPS
    xg = x_nchw.reshape(B, G, C // G, H, W)
    mean = xg.mean(axis=(2, 3, 4), keepdims=True)
    var = xg.var(axis=(2, 3, 4), keepdims=True)
    xn = (xg - mean) / jnp.sqrt(var + GN_EPS)
    xn = xn.reshape(B, C, H, W) * gamma[None, :, None, None] + beta[None, :, None, None]
    xa = xn * jax.nn.sigmoid(xn)
    out = jax.lax.conv_general_dilated(
        xa, conv_w, window_strides=(1, 1), padding="SAME",
        dimension_numbers=("NCHW", "OIHW", "NCHW"))
    return out + conv_b[None, :, None, None]


if __name__ == "__main__":
    # Small shapes consistent with the module (Cin must be divisible by 32).
    B, Cin, Cout, H, W = 2, 64, 4, 16, 16

    key = jax.random.PRNGKey(0)
    kx, kg, kb, kw, kbias = jax.random.split(key, 5)

    x = jax.random.normal(kx, (B, Cin, H, W), dtype=jnp.float32)
    gamma = 1.0 + 0.1 * jax.random.normal(kg, (Cin,), dtype=jnp.float32)
    beta = 0.1 * jax.random.normal(kb, (Cin,), dtype=jnp.float32)
    conv_w = 0.05 * jax.random.normal(kw, (Cout, Cin, 3, 3), dtype=jnp.float32)
    conv_b = 0.01 * jax.random.normal(kbias, (Cout,), dtype=jnp.float32)

    out = jax.block_until_ready(unet_output_layer(x, gamma, beta, conv_w, conv_b))

    ref = jax.block_until_ready(reference(x, gamma, beta, conv_w, conv_b))
    assert out.shape == (B, Cout, H, W), out.shape
    # bf16 MXU matmul + bf16 SiLU: tolerance loosened accordingly (stats are f32).
    np.testing.assert_allclose(np.asarray(out), np.asarray(ref), rtol=1e-2, atol=1e-2)

    print("KERNEL_OK")
</pallas_src>

<mosaic_0001>
module attributes {stable_mosaic.version = 11 : i64} {
  func.func @_stats_kernel(%arg0: i32, %arg1: i32, %arg2: memref<1x64x128xf32, #tpu.memory_space<vmem>>, %arg3: memref<64x1xf32, #tpu.memory_space<vmem>>, %arg4: memref<64x1xf32, #tpu.memory_space<vmem>>, %arg5: memref<64x32xf32, #tpu.memory_space<vmem>>, %arg6: memref<32x64xf32, #tpu.memory_space<vmem>>, %arg7: memref<1x64x1xf32, #tpu.memory_space<vmem>>, %arg8: memref<1x64x1xf32, #tpu.memory_space<vmem>>, %arg9: memref<64x1xf32, #tpu.memory_space<vmem>>, %arg10: memref<64x1xf32, #tpu.memory_space<vmem>>) attributes {dimension_semantics = [#tpu.dimension_semantics<parallel>, #tpu.dimension_semantics<arbitrary>], iteration_bounds = array<i64: 2, 2>, scalar_prefetch = 0 : i64, scratch_operands = 2 : i64, tpu.core_type = #tpu.core_type<tc>, window_params = [{transform_indices = @transform_0, window_bounds = array<i64: 1, 64, 128>}, {pipeline_mode = #tpu.pipeline_mode<synchronous>, transform_indices = @transform_1, window_bounds = array<i64: 64, 1>}, {pipeline_mode = #tpu.pipeline_mode<synchronous>, transform_indices = @transform_2, window_bounds = array<i64: 64, 1>}, {pipeline_mode = #tpu.pipeline_mode<synchronous>, transform_indices = @transform_3, window_bounds = array<i64: 64, 32>}, {pipeline_mode = #tpu.pipeline_mode<synchronous>, transform_indices = @transform_4, window_bounds = array<i64: 32, 64>}, {transform_indices = @transform_5, window_bounds = array<i64: 1, 64, 1>}, {transform_indices = @transform_6, window_bounds = array<i64: 1, 64, 1>}]} {
    %c0_i32 = arith.constant 0 : i32
    %0 = arith.cmpi eq, %arg1, %c0_i32 : i32
    %1 = arith.extui %0 : i1 to i32
    %c0_i32_0 = arith.constant 0 : i32
    %2 = arith.cmpi ne, %1, %c0_i32_0 : i32
    scf.if %2 {
      %cst_29 = arith.constant 0.000000e+00 : f32
      %43 = vector.broadcast %cst_29 : f32 to vector<64x1xf32>
      %c0_30 = arith.constant 0 : index
      %c0_31 = arith.constant 0 : index
      %44 = vector.load %arg9[%c0_30, %c0_31] : memref<64x1xf32, #tpu.memory_space<vmem>>, vector<64x1xf32>
      tpu.vector_store %arg9[%c0_30, %c0_31], %43 {strides = array<i32>} : memref<64x1xf32, #tpu.memory_space<vmem>>, vector<64x1xf32>,
      %cst_32 = arith.constant 0.000000e+00 : f32
      %45 = vector.broadcast %cst_32 : f32 to vector<64x1xf32>
      %c0_33 = arith.constant 0 : index
      %c0_34 = arith.constant 0 : index
      %46 = vector.load %arg10[%c0_33, %c0_34] : memref<64x1xf32, #tpu.memory_space<vmem>>, vector<64x1xf32>
      tpu.vector_store %arg10[%c0_33, %c0_34], %45 {strides = array<i32>} : memref<64x1xf32, #tpu.memory_space<vmem>>, vector<64x1xf32>,
    } else {
    }
    %c0 = arith.constant 0 : index
    %c0_1 = arith.constant 0 : index
    %c0_2 = arith.constant 0 : index
    %3 = vector.load %arg2[%c0, %c0_1, %c0_2] : memref<1x64x128xf32, #tpu.memory_space<vmem>>, vector<1x64x128xf32>
    %4 = vector.shape_cast %3 : vector<1x64x128xf32> to vector<64x128xf32>
    %c0_3 = arith.constant 0 : index
    %c0_4 = arith.constant 0 : index
    %5 = vector.load %arg9[%c0_3, %c0_4] : memref<64x1xf32, #tpu.memory_space<vmem>>, vector<64x1xf32>
    %cst = arith.constant dense<0.000000e+00> : vector<64xf32>
    %6 = vector.multi_reduction <add>, %4, %cst [1] : vector<64x128xf32> to vector<64xf32>
    %7 = vector.shape_cast %6 : vector<64xf32> to vector<64x1xf32>
    %8 = arith.addf %5, %7 : vector<64x1xf32>
    %c0_5 = arith.constant 0 : index
    %c0_6 = arith.constant 0 : index
    %9 = vector.load %arg9[%c0_5, %c0_6] : memref<64x1xf32, #tpu.memory_space<vmem>>, vector<64x1xf32>
    tpu.vector_store %arg9[%c0_5, %c0_6], %8 {strides = array<i32>} : memref<64x1xf32, #tpu.memory_space<vmem>>, vector<64x1xf32>,
    %c0_7 = arith.constant 0 : index
    %c0_8 = arith.constant 0 : index
    %10 = vector.load %arg10[%c0_7, %c0_8] : memref<64x1xf32, #tpu.memory_space<vmem>>, vector<64x1xf32>
    %11 = arith.mulf %4, %4 : vector<64x128xf32>
    %cst_9 = arith.constant dense<0.000000e+00> : vector<64xf32>
    %12 = vector.multi_reduction <add>, %11, %cst_9 [1] : vector<64x128xf32> to vector<64xf32>
    %13 = vector.shape_cast %12 : vector<64xf32> to vector<64x1xf32>
    %14 = arith.addf %10, %13 : vector<64x1xf32>
    %c0_10 = arith.constant 0 : index
    %c0_11 = arith.constant 0 : index
    %15 = vector.load %arg10[%c0_10, %c0_11] : memref<64x1xf32, #tpu.memory_space<vmem>>, vector<64x1xf32>
    tpu.vector_store %arg10[%c0_10, %c0_11], %14 {strides = array<i32>} : memref<64x1xf32, #tpu.memory_space<vmem>>, vector<64x1xf32>,
    %c0_12 = arith.constant 0 : index
    %c0_13 = arith.constant 0 : index
    %16 = vector.load %arg9[%c0_12, %c0_13] : memref<64x1xf32, #tpu.memory_space<vmem>>, vector<64x1xf32>
    %c0_14 = arith.constant 0 : index
    %c0_15 = arith.constant 0 : index
    %17 = vector.load %arg10[%c0_14, %c0_15] : memref<64x1xf32, #tpu.memory_space<vmem>>, vector<64x1xf32>
    %18 = tpu.concatenate %16, %17 in 1 : vector<64x1xf32>, vector<64x1xf32> -> vector<64x2xf32>
    %c0_16 = arith.constant 0 : index
    %c0_17 = arith.constant 0 : index
    %19 = vector.load %arg6[%c0_16, %c0_17] : memref<32x64xf32, #tpu.memory_space<vmem>>, vector<32x64xf32>
    %cst_18 = arith.constant dense<0.000000e+00> : vector<32x2xf32>
    %20 = tpu.matmul %19, %18, %cst_18 {dimension_numbers = #tpu.dot_dimension_numbers<[1], [0], [0], [1], [0, 0, 1, 1], [], []>} : vector<32x64xf32>, vector<64x2xf32>, vector<32x2xf32> -> vector<32x2xf32>
    %cst_19 = arith.constant 0.001953125 : f32
    %21 = vector.broadcast %cst_19 : f32 to vector<32x2xf32>
    %22 = arith.mulf %20, %21 : vector<32x2xf32>
    %23 = vector.extract_strided_slice %22 {offsets = [0, 0], sizes = [32, 1], strides = [1, 1]} : vector<32x2xf32> to vector<32x1xf32>
    %24 = vector.extract_strided_slice %22 {offsets = [0, 1], sizes = [32, 1], strides = [1, 1]} : vector<32x2xf32> to vector<32x1xf32>
    %25 = arith.mulf %23, %23 : vector<32x1xf32>
    %26 = arith.subf %24, %25 : vector<32x1xf32>
    %cst_20 = arith.constant 9.99999974E-6 : f32
    %27 = vector.broadcast %cst_20 : f32 to vector<32x1xf32>
    %28 = arith.addf %26, %27 : vector<32x1xf32>
    %29 = math.rsqrt %28 : vector<32x1xf32>
    %c0_21 = arith.constant 0 : index
    %c0_22 = arith.constant 0 : index
    %30 = vector.load %arg5[%c0_21, %c0_22] : memref<64x32xf32, #tpu.memory_space<vmem>>, vector<64x32xf32>
    %31 = tpu.concatenate %23, %29 in 1 : vector<32x1xf32>, vector<32x1xf32> -> vector<32x2xf32>
    %cst_23 = arith.constant dense<0.000000e+00> : vector<64x2xf32>
    %32 = tpu.matmul %30, %31, %cst_23 {dimension_numbers = #tpu.dot_dimension_numbers<[1], [0], [0], [1], [0, 0, 1, 1], [], []>} : vector<64x32xf32>, vector<32x2xf32>, vector<64x2xf32> -> vector<64x2xf32>
    %33 = vector.extract_strided_slice %32 {offsets = [0, 1], sizes = [64, 1], strides = [1, 1]} : vector<64x2xf32> to vector<64x1xf32>
    %c0_24 = arith.constant 0 : index
    %c0_25 = arith.constant 0 : index
    %34 = vector.load %arg3[%c0_24, %c0_25] : memref<64x1xf32, #tpu.memory_space<vmem>>, vector<64x1xf32>
    %35 = arith.mulf %33, %34 : vector<64x1xf32>
    %c0_26 = arith.constant 0 : index
    %c0_27 = arith.constant 0 : index
    %36 = vector.load %arg4[%c0_26, %c0_27] : memref<64x1xf32, #tpu.memory_space<vmem>>, vector<64x1xf32>
    %37 = vector.extract_strided_slice %32 {offsets = [0, 0], sizes = [64, 1], strides = [1, 1]} : vector<64x2xf32> to vector<64x1xf32>
    %38 = arith.mulf %37, %35 : vector<64x1xf32>
    %39 = arith.subf %36, %38 : vector<64x1xf32>
    %c1_i32 = arith.constant 1 : i32
    %40 = arith.cmpi eq, %arg1, %c1_i32 : i32
    %41 = arith.extui %40 : i1 to i32
    %c0_i32_28 = arith.constant 0 : i32
    %42 = arith.cmpi ne, %41, %c0_i32_28 : i32
    scf.if %42 {
      %c0_29 = arith.constant 0 : index
      %c0_30 = arith.constant 0 : index
      %c0_31 = arith.constant 0 : index
      %43 = vector.load %arg7[%c0_29, %c0_30, %c0_31] : memref<1x64x1xf32, #tpu.memory_space<vmem>>, vector<1x64x1xf32>
      %44 = vector.shape_cast %43 : vector<1x64x1xf32> to vector<64x1xf32>
      %45 = vector.shape_cast %35 : vector<64x1xf32> to vector<1x64x1xf32>
      tpu.vector_store %arg7[%c0_29, %c0_30, %c0_31], %45 {strides = array<i32>} : memref<1x64x1xf32, #tpu.memory_space<vmem>>, vector<1x64x1xf32>,
      %c0_32 = arith.constant 0 : index
      %c0_33 = arith.constant 0 : index
      %c0_34 = arith.constant 0 : index
      %46 = vector.load %arg8[%c0_32, %c0_33, %c0_34] : memref<1x64x1xf32, #tpu.memory_space<vmem>>, vector<1x64x1xf32>
      %47 = vector.shape_cast %46 : vector<1x64x1xf32> to vector<64x1xf32>
      %48 = vector.shape_cast %39 : vector<64x1xf32> to vector<1x64x1xf32>
      tpu.vector_store %arg8[%c0_32, %c0_33, %c0_34], %48 {strides = array<i32>} : memref<1x64x1xf32, #tpu.memory_space<vmem>>, vector<1x64x1xf32>,
    } else {
    }
    return
  }
  func.func @transform_0(%arg0: i32, %arg1: i32) -> (i32, i32, i32) {
    %c0_i32 = arith.constant 0 : i32
    %c0_i32_0 = arith.constant 0 : i32
    return %arg0, %c0_i32, %arg1 : i32, i32, i32
  }
  func.func @transform_1(%arg0: i32, %arg1: i32) -> (i32, i32) {
    %c0_i32 = arith.constant 0 : i32
    %c0_i32_0 = arith.constant 0 : i32
    %c0_i32_1 = arith.constant 0 : i32
    return %c0_i32, %c0_i32_0 : i32, i32
  }
  func.func @transform_2(%arg0: i32, %arg1: i32) -> (i32, i32) {
    %c0_i32 = arith.constant 0 : i32
    %c0_i32_0 = arith.constant 0 : i32
    %c0_i32_1 = arith.constant 0 : i32
    return %c0_i32, %c0_i32_0 : i32, i32
  }
  func.func @transform_3(%arg0: i32, %arg1: i32) -> (i32, i32) {
    %c0_i32 = arith.constant 0 : i32
    %c0_i32_0 = arith.constant 0 : i32
    %c0_i32_1 = arith.constant 0 : i32
    return %c0_i32, %c0_i32_0 : i32, i32
  }
  func.func @transform_4(%arg0: i32, %arg1: i32) -> (i32, i32) {
    %c0_i32 = arith.constant 0 : i32
    %c0_i32_0 = arith.constant 0 : i32
    %c0_i32_1 = arith.constant 0 : i32
    return %c0_i32, %c0_i32_0 : i32, i32
  }
  func.func @transform_5(%arg0: i32, %arg1: i32) -> (i32, i32, i32) {
    %c0_i32 = arith.constant 0 : i32
    %c0_i32_0 = arith.constant 0 : i32
    %c0_i32_1 = arith.constant 0 : i32
    return %arg0, %c0_i32, %c0_i32_0 : i32, i32, i32
  }
  func.func @transform_6(%arg0: i32, %arg1: i32) -> (i32, i32, i32) {
    %c0_i32 = arith.constant 0 : i32
    %c0_i32_0 = arith.constant 0 : i32
    %c0_i32_1 = arith.constant 0 : i32
    return %arg0, %c0_i32, %c0_i32_0 : i32, i32, i32
  }
}

module attributes {stable_mosaic.version = 11 : i64} {
  func.func @_apply_kernel(%arg0: i32, %arg1: i32, %arg2: memref<1x64x128xf32, #tpu.memory_space<vmem>>, %arg3: memref<1x1x64x16xf32, #tpu.memory_space<vmem>>, %arg4: memref<1x1x64x16xf32, #tpu.memory_space<vmem>>, %arg5: memref<1x64x1xf32, #tpu.memory_space<vmem>>, %arg6: memref<1x64x1xf32, #tpu.memory_space<vmem>>, %arg7: memref<72x64xbf16, #tpu.memory_space<vmem>>, %arg8: memref<4x1xf32, #tpu.memory_space<vmem>>, %arg9: memref<2x128xbf16, #tpu.memory_space<vmem>>, %arg10: memref<1x4x128xf32, #tpu.memory_space<vmem>>) attributes {dimension_semantics = [#tpu.dimension_semantics<parallel>, #tpu.dimension_semantics<parallel>], iteration_bounds = array<i64: 2, 2>, scalar_prefetch = 0 : i64, scratch_operands = 0 : i64, tpu.core_type = #tpu.core_type<tc>, window_params = [{transform_indices = @transform_0, window_bounds = array<i64: 1, 64, 128>}, {transform_indices = @transform_1, window_bounds = array<i64: 1, 1, 64, 16>}, {transform_indices = @transform_2, window_bounds = array<i64: 1, 1, 64, 16>}, {transform_indices = @transform_3, window_bounds = array<i64: 1, 64, 1>}, {transform_indices = @transform_4, window_bounds = array<i64: 1, 64, 1>}, {pipeline_mode = #tpu.pipeline_mode<synchronous>, transform_indices = @transform_5, window_bounds = array<i64: 72, 64>}, {pipeline_mode = #tpu.pipeline_mode<synchronous>, transform_indices = @transform_6, window_bounds = array<i64: 4, 1>}, {pipeline_mode = #tpu.pipeline_mode<synchronous>, transform_indices = @transform_7, window_bounds = array<i64: 2, 128>}, {transform_indices = @transform_8, window_bounds = array<i64: 1, 4, 128>}]} {
    %c0 = arith.constant 0 : index
    %c0_0 = arith.constant 0 : index
    %c0_1 = arith.constant 0 : index
    %0 = vector.load %arg5[%c0, %c0_0, %c0_1] : memref<1x64x1xf32, #tpu.memory_space<vmem>>, vector<1x64x1xf32>
    %1 = vector.shape_cast %0 : vector<1x64x1xf32> to vector<64x1xf32>
    %c0_2 = arith.constant 0 : index
    %c0_3 = arith.constant 0 : index
    %c0_4 = arith.constant 0 : index
    %2 = vector.load %arg6[%c0_2, %c0_3, %c0_4] : memref<1x64x1xf32, #tpu.memory_space<vmem>>, vector<1x64x1xf32>
    %3 = vector.shape_cast %2 : vector<1x64x1xf32> to vector<64x1xf32>
    %c0_5 = arith.constant 0 : index
    %c0_6 = arith.constant 0 : index
    %c0_7 = arith.constant 0 : index
    %4 = vector.load %arg2[%c0_5, %c0_6, %c0_7] : memref<1x64x128xf32, #tpu.memory_space<vmem>>, vector<1x64x128xf32>
    %5 = vector.shape_cast %4 : vector<1x64x128xf32> to vector<64x128xf32>
    %6 = vector.broadcast %1 : vector<64x1xf32> to vector<64x128xf32>
    %7 = arith.mulf %5, %6 : vector<64x128xf32>
    %8 = vector.broadcast %3 : vector<64x1xf32> to vector<64x128xf32>
    %9 = arith.addf %7, %8 : vector<64x128xf32>
    %10 = arith.truncf %9 : vector<64x128xf32> to vector<64x128xbf16>
    %11 = arith.negf %10 : vector<64x128xbf16>
    %12 = math.exp %11 : vector<64x128xbf16>
    %cst = arith.constant 1.000000e+00 : bf16
    %13 = vector.broadcast %cst : bf16 to vector<64x128xbf16>
    %14 = arith.addf %13, %12 : vector<64x128xbf16>
    %15 = arith.divf %13, %14 : vector<64x128xbf16>
    %16 = arith.mulf %10, %15 : vector<64x128xbf16>
    %c0_8 = arith.constant 0 : index
    %c0_9 = arith.constant 0 : index
    %c0_10 = arith.constant 0 : index
    %c0_11 = arith.constant 0 : index
    %17 = vector.load %arg3[%c0_8, %c0_9, %c0_10, %c0_11] : memref<1x1x64x16xf32, #tpu.memory_space<vmem>>, vector<1x1x64x16xf32>
    %18 = vector.shape_cast %17 : vector<1x1x64x16xf32> to vector<64x16xf32>
    %19 = vector.broadcast %1 : vector<64x1xf32> to vector<64x16xf32>
    %20 = arith.mulf %18, %19 : vector<64x16xf32>
    %21 = vector.broadcast %3 : vector<64x1xf32> to vector<64x16xf32>
    %22 = arith.addf %20, %21 : vector<64x16xf32>
    %23 = arith.truncf %22 : vector<64x16xf32> to vector<64x16xbf16>
    %24 = arith.negf %23 : vector<64x16xbf16>
    %25 = math.exp %24 : vector<64x16xbf16>
    %cst_12 = arith.constant 1.000000e+00 : bf16
    %26 = vector.broadcast %cst_12 : bf16 to vector<64x16xbf16>
    %27 = arith.addf %26, %25 : vector<64x16xbf16>
    %28 = arith.divf %26, %27 : vector<64x16xbf16>
    %29 = arith.mulf %23, %28 : vector<64x16xbf16>
    %c0_13 = arith.constant 0 : index
    %c0_14 = arith.constant 0 : index
    %c0_15 = arith.constant 0 : index
    %c0_16 = arith.constant 0 : index
    %30 = vector.load %arg4[%c0_13, %c0_14, %c0_15, %c0_16] : memref<1x1x64x16xf32, #tpu.memory_space<vmem>>, vector<1x1x64x16xf32>
    %31 = vector.shape_cast %30 : vector<1x1x64x16xf32> to vector<64x16xf32>
    %32 = vector.broadcast %1 : vector<64x1xf32> to vector<64x16xf32>
    %33 = arith.mulf %31, %32 : vector<64x16xf32>
    %34 = vector.broadcast %3 : vector<64x1xf32> to vector<64x16xf32>
    %35 = arith.addf %33, %34 : vector<64x16xf32>
    %36 = arith.truncf %35 : vector<64x16xf32> to vector<64x16xbf16>
    %37 = arith.negf %36 : vector<64x16xbf16>
    %38 = math.exp %37 : vector<64x16xbf16>
    %cst_17 = arith.constant 1.000000e+00 : bf16
    %39 = vector.broadcast %cst_17 : bf16 to vector<64x16xbf16>
    %40 = arith.addf %39, %38 : vector<64x16xbf16>
    %41 = arith.divf %39, %40 : vector<64x16xbf16>
    %42 = arith.mulf %36, %41 : vector<64x16xbf16>
    %c0_i32 = arith.constant 0 : i32
    %43 = arith.cmpi sgt, %arg1, %c0_i32 : i32
    %cst_18 = arith.constant 1.000000e+00 : f32
    %cst_19 = arith.constant 0.000000e+00 : f32
    %44 = arith.select %43, %cst_18, %cst_19 : f32
    %45 = arith.truncf %44 : f32 to bf16
    %c1_i32 = arith.constant 1 : i32
    %46 = arith.cmpi slt, %arg1, %c1_i32 : i32
    %cst_20 = arith.constant 1.000000e+00 : f32
    %cst_21 = arith.constant 0.000000e+00 : f32
    %47 = arith.select %46, %cst_20, %cst_21 : f32
    %48 = arith.truncf %47 : f32 to bf16
    %49 = vector.broadcast %45 : bf16 to vector<64x16xbf16>
    %50 = arith.mulf %29, %49 : vector<64x16xbf16>
    %51 = vector.broadcast %48 : bf16 to vector<64x16xbf16>
    %52 = arith.mulf %42, %51 : vector<64x16xbf16>
    %53 = tpu.concatenate %50, %16, %52 in 1 : vector<64x16xbf16>, vector<64x128xbf16>, vector<64x16xbf16> -> vector<64x160xbf16>
    %c0_22 = arith.constant 0 : index
    %c0_23 = arith.constant 0 : index
    %54 = vector.load %arg7[%c0_22, %c0_23] : memref<72x64xbf16, #tpu.memory_space<vmem>>, vector<72x64xbf16>
    %cst_24 = arith.constant dense<0.000000e+00> : vector<72x160xf32>
    %55 = tpu.matmul %54, %53, %cst_24 {dimension_numbers = #tpu.dot_dimension_numbers<[1], [0], [0], [1], [0, 0, 1, 1], [], []>} : vector<72x64xbf16>, vector<64x160xbf16>, vector<72x160xf32> -> vector<72x160xf32>
    %56 = vector.extract_strided_slice %55 {offsets = [32, 0], sizes = [8, 160], strides = [1, 1]} : vector<72x160xf32> to vector<8x160xf32>
    %57 = vector.extract_strided_slice %56 {offsets = [0, 16], sizes = [8, 128], strides = [1, 1]} : vector<8x160xf32> to vector<8x128xf32>
    %58 = vector.extract_strided_slice %55 {offsets = [0, 0], sizes = [8, 160], strides = [1, 1]} : vector<72x160xf32> to vector<8x160xf32>
    %59 = vector.extract_strided_slice %58 {offsets = [0, 159], sizes = [8, 1], strides = [1, 1]} : vector<8x160xf32> to vector<8x1xf32>
    %60 = vector.extract_strided_slice %58 {offsets = [0, 0], sizes = [8, 159], strides = [1, 1]} : vector<8x160xf32> to vector<8x159xf32>
    %61 = tpu.concatenate %59, %60 in 1 : vector<8x1xf32>, vector<8x159xf32> -> vector<8x160xf32>
    %62 = vector.extract_strided_slice %61 {offsets = [0, 0], sizes = [8, 128], strides = [1, 1]} : vector<8x160xf32> to vector<8x128xf32>
    %c0_25 = arith.constant 0 : index
    %c0_26 = arith.constant 0 : index
    %63 = vector.load %arg9[%c0_25, %c0_26] : memref<2x128xbf16, #tpu.memory_space<vmem>>, vector<1x128xbf16>
    %64 = arith.extf %63 : vector<1x128xbf16> to vector<1x128xf32>
    %65 = vector.broadcast %64 : vector<1x128xf32> to vector<8x128xf32>
    %66 = arith.mulf %62, %65 : vector<8x128xf32>
    %67 = arith.addf %57, %66 : vector<8x128xf32>
    %68 = vector.extract_strided_slice %55 {offsets = [8, 0], sizes = [8, 160], strides = [1, 1]} : vector<72x160xf32> to vector<8x160xf32>
    %69 = vector.extract_strided_slice %68 {offsets = [0, 0], sizes = [8, 128], strides = [1, 1]} : vector<8x160xf32> to vector<8x128xf32>
    %70 = arith.addf %67, %69 : vector<8x128xf32>
    %71 = vector.extract_strided_slice %55 {offsets = [16, 0], sizes = [8, 160], strides = [1, 1]} : vector<72x160xf32> to vector<8x160xf32>
    %72 = vector.extract_strided_slice %71 {offsets = [0, 1], sizes = [8, 128], strides = [1, 1]} : vector<8x160xf32> to vector<8x128xf32>
    %c1 = arith.constant 1 : index
    %c0_27 = arith.constant 0 : index
    %73 = vector.load %arg9[%c1, %c0_27] : memref<2x128xbf16, #tpu.memory_space<vmem>>, vector<1x128xbf16>
    %74 = arith.extf %73 : vector<1x128xbf16> to vector<1x128xf32>
    %75 = vector.broadcast %74 : vector<1x128xf32> to vector<8x128xf32>
    %76 = arith.mulf %72, %75 : vector<8x128xf32>
    %77 = arith.addf %70, %76 : vector<8x128xf32>
    %78 = vector.extract_strided_slice %55 {offsets = [24, 0], sizes = [8, 160], strides = [1, 1]} : vector<72x160xf32> to vector<8x160xf32>
    %79 = vector.extract_strided_slice %78 {offsets = [0, 15], sizes = [8, 128], strides = [1, 1]} : vector<8x160xf32> to vector<8x128xf32>
    %c0_28 = arith.constant 0 : index
    %c0_29 = arith.constant 0 : index
    %80 = vector.load %arg9[%c0_28, %c0_29] : memref<2x128xbf16, #tpu.memory_space<vmem>>, vector<1x128xbf16>
    %81 = arith.extf %80 : vector<1x128xbf16> to vector<1x128xf32>
    %82 = vector.broadcast %81 : vector<1x128xf32> to vector<8x128xf32>
    %83 = arith.mulf %79, %82 : vector<8x128xf32>
    %84 = arith.addf %77, %83 : vector<8x128xf32>
    %85 = vector.extract_strided_slice %55 {offsets = [40, 0], sizes = [8, 160], strides = [1, 1]} : vector<72x160xf32> to vector<8x160xf32>
    %86 = vector.extract_strided_slice %85 {offsets = [0, 17], sizes = [8, 128], strides = [1, 1]} : vector<8x160xf32> to vector<8x128xf32>
    %c1_30 = arith.constant 1 : index
    %c0_31 = arith.constant 0 : index
    %87 = vector.load %arg9[%c1_30, %c0_31] : memref<2x128xbf16, #tpu.memory_space<vmem>>, vector<1x128xbf16>
    %88 = arith.extf %87 : vector<1x128xbf16> to vector<1x128xf32>
    %89 = vector.broadcast %88 : vector<1x128xf32> to vector<8x128xf32>
    %90 = arith.mulf %86, %89 : vector<8x128xf32>
    %91 = arith.addf %84, %90 : vector<8x128xf32>
    %92 = vector.extract_strided_slice %55 {offsets = [48, 0], sizes = [8, 160], strides = [1, 1]} : vector<72x160xf32> to vector<8x160xf32>
    %93 = vector.extract_strided_slice %92 {offsets = [0, 31], sizes = [8, 128], strides = [1, 1]} : vector<8x160xf32> to vector<8x128xf32>
    %c0_32 = arith.constant 0 : index
    %c0_33 = arith.constant 0 : index
    %94 = vector.load %arg9[%c0_32, %c0_33] : memref<2x128xbf16, #tpu.memory_space<vmem>>, vector<1x128xbf16>
    %95 = arith.extf %94 : vector<1x128xbf16> to vector<1x128xf32>
    %96 = vector.broadcast %95 : vector<1x128xf32> to vector<8x128xf32>
    %97 = arith.mulf %93, %96 : vector<8x128xf32>
    %98 = arith.addf %91, %97 : vector<8x128xf32>
    %99 = vector.extract_strided_slice %55 {offsets = [56, 0], sizes = [8, 160], strides = [1, 1]} : vector<72x160xf32> to vector<8x160xf32>
    %100 = vector.extract_strided_slice %99 {offsets = [0, 32], sizes = [8, 128], strides = [1, 1]} : vector<8x160xf32> to vector<8x128xf32>
    %101 = arith.addf %98, %100 : vector<8x128xf32>
    %102 = vector.extract_strided_slice %55 {offsets = [64, 0], sizes = [8, 160], strides = [1, 1]} : vector<72x160xf32> to vector<8x160xf32>
    %103 = vector.extract_strided_slice %102 {offsets = [0, 33], sizes = [8, 127], strides = [1, 1]} : vector<8x160xf32> to vector<8x127xf32>
    %104 = vector.extract_strided_slice %102 {offsets = [0, 0], sizes = [8, 33], strides = [1, 1]} : vector<8x160xf32> to vector<8x33xf32>
    %105 = tpu.concatenate %103, %104 in 1 : vector<8x127xf32>, vector<8x33xf32> -> vector<8x160xf32>
    %106 = vector.extract_strided_slice %105 {offsets = [0, 0], sizes = [8, 128], strides = [1, 1]} : vector<8x160xf32> to vector<8x128xf32>
    %c1_34 = arith.constant 1 : index
    %c0_35 = arith.constant 0 : index
    %107 = vector.load %arg9[%c1_34, %c0_35] : memref<2x128xbf16, #tpu.memory_space<vmem>>, vector<1x128xbf16>
    %108 = arith.extf %107 : vector<1x128xbf16> to vector<1x128xf32>
    %109 = vector.broadcast %108 : vector<1x128xf32> to vector<8x128xf32>
    %110 = arith.mulf %106, %109 : vector<8x128xf32>
    %111 = arith.addf %101, %110 : vector<8x128xf32>
    %112 = vector.extract_strided_slice %111 {offsets = [0, 0], sizes = [4, 128], strides = [1, 1]} : vector<8x128xf32> to vector<4x128xf32>
    %c0_36 = arith.constant 0 : index
    %c0_37 = arith.constant 0 : index
    %113 = vector.load %arg8[%c0_36, %c0_37] : memref<4x1xf32, #tpu.memory_space<vmem>>, vector<4x1xf32>
    %114 = vector.broadcast %113 : vector<4x1xf32> to vector<4x128xf32>
    %115 = arith.addf %112, %114 : vector<4x128xf32>
    %c0_38 = arith.constant 0 : index
    %c0_39 = arith.constant 0 : index
    %c0_40 = arith.constant 0 : index
    %116 = vector.load %arg10[%c0_38, %c0_39, %c0_40] : memref<1x4x128xf32, #tpu.memory_space<vmem>>, vector<1x4x128xf32>
    %117 = vector.shape_cast %116 : vector<1x4x128xf32> to vector<4x128xf32>
    %118 = vector.shape_cast %115 : vector<4x128xf32> to vector<1x4x128xf32>
    tpu.vector_store %arg10[%c0_38, %c0_39, %c0_40], %118 {strides = array<i32>} : memref<1x4x128xf32, #tpu.memory_space<vmem>>, vector<1x4x128xf32>,
    return
  }
  func.func @transform_0(%arg0: i32, %arg1: i32) -> (i32, i32, i32) {
    %c0_i32 = arith.constant 0 : i32
    %c0_i32_0 = arith.constant 0 : i32
    return %arg0, %c0_i32, %arg1 : i32, i32, i32
  }
  func.func @transform_1(%arg0: i32, %arg1: i32) -> (i32, i32, i32, i32) {
    %c0_i32 = arith.constant 0 : i32
    %c0_i32_0 = arith.constant 0 : i32
    %c0_i32_1 = arith.constant 0 : i32
    return %arg0, %arg1, %c0_i32, %c0_i32_0 : i32, i32, i32, i32
  }
  func.func @transform_2(%arg0: i32, %arg1: i32) -> (i32, i32, i32, i32) {
    %c0_i32 = arith.constant 0 : i32
    %c0_i32_0 = arith.constant 0 : i32
    %c0_i32_1 = arith.constant 0 : i32
    return %arg0, %arg1, %c0_i32, %c0_i32_0 : i32, i32, i32, i32
  }
  func.func @transform_3(%arg0: i32, %arg1: i32) -> (i32, i32, i32) {
    %c0_i32 = arith.constant 0 : i32
    %c0_i32_0 = arith.constant 0 : i32
    %c0_i32_1 = arith.constant 0 : i32
    return %arg0, %c0_i32, %c0_i32_0 : i32, i32, i32
  }
  func.func @transform_4(%arg0: i32, %arg1: i32) -> (i32, i32, i32) {
    %c0_i32 = arith.constant 0 : i32
    %c0_i32_0 = arith.constant 0 : i32
    %c0_i32_1 = arith.constant 0 : i32
    return %arg0, %c0_i32, %c0_i32_0 : i32, i32, i32
  }
  func.func @transform_5(%arg0: i32, %arg1: i32) -> (i32, i32) {
    %c0_i32 = arith.constant 0 : i32
    %c0_i32_0 = arith.constant 0 : i32
    %c0_i32_1 = arith.constant 0 : i32
    return %c0_i32, %c0_i32_0 : i32, i32
  }
  func.func @transform_6(%arg0: i32, %arg1: i32) -> (i32, i32) {
    %c0_i32 = arith.constant 0 : i32
    %c0_i32_0 = arith.constant 0 : i32
    %c0_i32_1 = arith.constant 0 : i32
    return %c0_i32, %c0_i32_0 : i32, i32
  }
  func.func @transform_7(%arg0: i32, %arg1: i32) -> (i32, i32) {
    %c0_i32 = arith.constant 0 : i32
    %c0_i32_0 = arith.constant 0 : i32
    %c0_i32_1 = arith.constant 0 : i32
    return %c0_i32, %c0_i32_0 : i32, i32
  }
  func.func @transform_8(%arg0: i32, %arg1: i32) -> (i32, i32, i32) {
    %c0_i32 = arith.constant 0 : i32
    %c0_i32_0 = arith.constant 0 : i32
    return %arg0, %c0_i32, %arg1 : i32, i32, i32
  }
}

</mosaic_0001>

<bundles_post_ra>
// kernel: unet_output_layer.2
= control target key start
LH: loop header
LB: loop body
LE: loop exit
PB: predicated region body
PF: predicated region fallthrough
CT: control target
= control target key end

     0   :  { %s1330_s21 = smov 0   ;;  %s1332_s22 = smov 0   ;;  %s1626_s0 = inlined_call_operand.vmem [shape: f32[2,64,256], index: 0, kind: input, shape index: {}]   ;;  %s1627_s1 = inlined_call_operand.vmem [shape: f32[64,1], index: 1, kind: input, shape index: {}]   ;;  %s1628_s2 = inlined_call_operand.vmem [shape: f32[64,1], index: 2, kind: input, shape index: {}]   ;;  %s1629_s3 = inlined_call_operand.vmem [shape: f32[64,32], index: 3, kind: input, shape index: {}]   ;;  %s1630_s4 = inlined_call_operand.vmem [shape: f32[32,64], index: 4, kind: input, shape index: {}]   ;;  %s1631_s5 = inlined_call_operand.vmem [shape: f32[2,64,1], index: 5, kind: output, shape index: {0}]   ;;  %s1632_s6 = inlined_call_operand.vmem [shape: f32[2,64,1], index: 6, kind: output, shape index: {1}]  }
   0x1   :  { %s1334_s23 = smov 0   ;;  %s1336_s24 = smov 0  }
   0x2   :  { %s1338_s25 = smov 0   ;;  %s1340_s26 = smov 0  }
   0x3   :  { %s1342_s27 = smov 0  }
   0x4 LB: > { %s26_s28 = sadd.s32 1, %s1282_s25  ;;  %s29_s29 = sadd.s32 1, %s1286_s26  ;;  %s1290_s27 = sphi %s1342_s27, %s17_s27   ;;  %s1286_s26 = sphi %s1340_s26, %s1638_s26   ;;  %s1282_s25 = sphi %s1338_s25, %s1637_s25   ;;  %s1278_s24 = sphi %s1336_s24, %s1636_s24   ;;  %s1274_s23 = sphi %s1334_s23, %s1635_s23   ;;  %s1270_s22 = sphi %s1332_s22, %s1634_s22   ;;  %s1266_s21 = sphi %s1330_s21, %s1633_s21  }
   0x5   : > { %p27_p0 = scmp.ge.s32.totalorder %s26_s28, 2  ;;  %p45_p1 = scmp.ne.s32.totalorder %s1270_s22, %s1266_s21 }
   0x6   : > { %p46_p2 = scmp.eq.s32.totalorder %s1290_s27, 0  ;;  %s38_s9 = sadd.s32 1, %s1270_s22 }
   0x7   : > { %s1640_s28 = smov (%p27_p0, %s26_s28), 0  ;;  %s1642_s29 = smov (!%p27_p0, %s29_s29), %s1286_s26 }
   0x8   : > { %p47_p3 = por %p46_p2, %p45_p1  ;;  %p31_p4 = scmp.ge.s32.totalorder %s1642_s29, 2 }
   0x9   : > { %s34_s30 = ssub.s32 %s1282_s25, %s1640_s28  ;;  %p1031_p6 = scmp.ge.s32.totalorder %s1290_s27, 4 }
   0xa   : > { %s1644_s29 = smov (%p31_p4, %s1642_s29), 0 }
   0xb   : > { %s33_s7 = ssub.s32 %s1286_s26, %s1644_s29  ;;  %219 = sbr.rel (%p1031_p6) target bundleno = 28 (0x1c), region = 32 }
   0xc   : > { %s35_s8 = sor.u32 %s34_s30, %s33_s7 }
   0xd   : > { %p36_p5 = scmp.eq.s32.totalorder %s35_s8, 0 }
   0xf   : > { %s1381_s10 = scalar_select %p36_p5, %s1270_s22, %s38_s9  }
  0x12   : > { %222 = sbr.rel (!%p47_p3) target bundleno = 28 (0x1c), region = 36  ;;  %s224_s11 = sand.u32 (%p47_p3), 1, %s1270_s22  }
  0x13   : > { %s1033_s12 = sshll.u32 (%p47_p3), %s1286_s26, 4  ;;  %s1032_s13 = sshll.u32 (%p47_p3), %s224_s11, 6 }
  0x14   : > { %s228_s14 = sadd.s32 (%p47_p3), %s1282_s25, %s1033_s12  ;;  %s226_s19 = scalar_lea.vmem (%p47_p3), [#allocation4], %s1032_s13 }
  0x15   : > { %s1034_s15 = sshll.u32 (%p47_p3), %s228_s14, 3 }
  0x16   : > { %s230_s18 = scalar_lea.vmem (%p47_p3), %s1626_s0, %s1034_s15 }
  0x17   : > { %v272_v0 = vld [vmem:[%s230_s18] sm:$0xff] (%p47_p3)  ;;  %v274_v1 = vld [vmem:[%s230_s18 + $0x10] sm:$0xff] (%p47_p3) }
  0x18   : > { %v276_v2 = vld [vmem:[%s230_s18 + $0x20] sm:$0xff] (%p47_p3)  ;;  %273 = vst [vmem:[%s226_s19] sm:$0xff] (%p47_p3), %v272_v0  ;;  %275 = vst [vmem:[%s226_s19 + $0x8] sm:$0xff] (%p47_p3), %v274_v1  ;;  %v278_v3 = vld [vmem:[%s230_s18 + $0x30] sm:$0xff] (%p47_p3) }
  0x19   : > { %277 = vst [vmem:[%s226_s19 + $0x10] sm:$0xff] %v276_v2  ;;  %v280_v4 = vld [vmem:[%s230_s18 + $0x40] sm:$0xff]  ;;  %v282_v5 = vld [vmem:[%s230_s18 + $0x50] sm:$0xff]  ;;  %279 = vst [vmem:[%s226_s19 + $0x18] sm:$0xff] %v278_v3 }
  0x1a   : > { %281 = vst [vmem:[%s226_s19 + $0x20] sm:$0xff] %v280_v4  ;;  %283 = vst [vmem:[%s226_s19 + $0x28] sm:$0xff] %v282_v5  ;;  %v284_v6 = vld [vmem:[%s230_s18 + $0x60] sm:$0xff]  ;;  %v286_v7 = vld [vmem:[%s230_s18 + $0x70] sm:$0xff] }
  0x1b   : > { %285 = vst [vmem:[%s226_s19 + $0x30] sm:$0xff] %v284_v6  ;;  %287 = vst [vmem:[%s226_s19 + $0x38] sm:$0xff] %v286_v7 }
  0x1c PF: > { %p1035_p7 = scmp.ge.s32.totalorder %s1290_s27, 1  ;;  %p292_p8 = scmp.lt.s32.totalorder %s1290_s27, 5 }
  0x1e   : > { %p293_p9 = pnand %p1035_p7, %p292_p8 }
  0x1f   : > { %s299_s20 = sand.u32 (!%p293_p9), 1, %s1266_s21   ;;  %p333_p10 = scmp.lt.s32.totalorder (!%p293_p9), %s1278_s24, 1 }
  0x20   : > { %296 = sbr.rel (%p293_p9) target bundleno = 1051 (0x41b), region = 74  ;;  %s1036_s30 = sshll.u32 (!%p293_p9), %s299_s20, 6 }
  0x21   : > { %s1405_s15 = scalar_lea.vmem (!%p293_p9), [#allocation4], %s1036_s30  ;;  %p1041_p11 = scmp.ne.s32.totalorder (!%p293_p9), %s1274_s23, 0 }
  0x27   : > { %s1646_s24 = smov (!%p333_p10, %s1278_s24), 1  ;;  %346 = sbr.rel (%p1041_p11) target bundleno = 49 (0x31), region = 82 }
  0x28   : > { %s1057_s7 = sshll.u32 %s1646_s24, 6  ;;  %vm347_vm0 = vcmask (!%p1041_p11), 7168   ;;  %v1292_v8 = vmov (!%p1041_p11), 0.0  }
  0x29   : > { %s1398_s11 = scalar_lea.vmem %s1631_s5, %s1057_s7  ;;  %s1403_s14 = scalar_lea.vmem %s1632_s6, %s1057_s7  ;;  %348 = vst.msk [vmem:[#allocation2] sm:$0xff] (!%p1041_p11), %vm347_vm0, %v1292_v8  ;;  %349 = vst.msk [vmem:[#allocation2 + $0x8] sm:$0xff] (!%p1041_p11), %vm347_vm0, %v1292_v8 }
  0x2a   : > { %350 = vst.msk [vmem:[#allocation2 + $0x10] sm:$0xff] (!%p1041_p11), %vm347_vm0, %v1292_v8  ;;  %351 = vst.msk [vmem:[#allocation2 + $0x18] sm:$0xff] (!%p1041_p11), %vm347_vm0, %v1292_v8 }
  0x2b   : > { %352 = vst.msk [vmem:[#allocation2 + $0x20] sm:$0xff] (!%p1041_p11), %vm347_vm0, %v1292_v8  ;;  %353 = vst.msk [vmem:[#allocation2 + $0x28] sm:$0xff] (!%p1041_p11), %vm347_vm0, %v1292_v8 }
  0x2c   : > { %354 = vst.msk [vmem:[#allocation2 + $0x30] sm:$0xff] (!%p1041_p11), %vm347_vm0, %v1292_v8  ;;  %355 = vst.msk [vmem:[#allocation2 + $0x38] sm:$0xff] (!%p1041_p11), %vm347_vm0, %v1292_v8 }
  0x2d   : > { %356 = vst.msk [vmem:[#allocation3] sm:$0xff] (!%p1041_p11), %vm347_vm0, %v1292_v8  ;;  %357 = vst.msk [vmem:[#allocation3 + $0x8] sm:$0xff] (!%p1041_p11), %vm347_vm0, %v1292_v8 }
  0x2e   : > { %358 = vst.msk [vmem:[#allocation3 + $0x10] sm:$0xff] %vm347_vm0, %v1292_v8  ;;  %359 = vst.msk [vmem:[#allocation3 + $0x18] sm:$0xff] %vm347_vm0, %v1292_v8 }
  0x2f   : > { %360 = vst.msk [vmem:[#allocation3 + $0x20] sm:$0xff] %vm347_vm0, %v1292_v8  ;;  %361 = vst.msk [vmem:[#allocation3 + $0x28] sm:$0xff] %vm347_vm0, %v1292_v8 }
  0x30   : > { %362 = vst.msk [vmem:[#allocation3 + $0x30] sm:$0xff] %vm347_vm0, %v1292_v8  ;;  %363 = vst.msk [vmem:[#allocation3 + $0x38] sm:$0xff] %vm347_vm0, %v1292_v8 }
  0x31 PF: > { %v366_v9 = vld [vmem:[%s1405_s15 + $0x10] sm:$0xff]  ;;  %v364_v10 = vld [vmem:[%s1405_s15] sm:$0xff]  ;;  %v367_v11 = vld [vmem:[%s1405_s15 + $0x18] sm:$0xff]  ;;  %vm404_vm1 = vcmask 7168   ;;  %s1293_s21 = smov 1   ;;  %vm521_vm2 = vcmask 523264  }
  0x32   : > { %v423_v12 = vmul.f32 %v366_v9, %v366_v9  ;;  %v421_v13 = vmul.f32 %v364_v10, %v364_v10  ;;  %v365_v14 = vld [vmem:[%s1405_s15 + $0x8] sm:$0xff]  ;;  %v424_v15 = vmul.f32 %v367_v11, %v367_v11  ;;  %v368_v18 = vld [vmem:[%s1405_s15 + $0x20] sm:$0xff]  ;;  %v371_v21 = vld [vmem:[%s1405_s15 + $0x38] sm:$0xff]  ;;  %vm667_vm3 = vcmask 261120   ;;  %p1054_p12 = scmp.ne.s32.totalorder %s1274_s23, 1 }
  0x33   : > { %v422_v16 = vmul.f32 %v365_v14, %v365_v14  ;;  %v369_v17 = vld [vmem:[%s1405_s15 + $0x28] sm:$0xff]  ;;  %v425_v20 = vmul.f32 %v368_v18, %v368_v18  ;;  %v370_v22 = vld [vmem:[%s1405_s15 + $0x30] sm:$0xff]  ;;  %v428_v23 = vmul.f32 %v371_v21, %v371_v21  ;;  %v372_v51 = vld [vmem:[#allocation2] sm:$0xff] }
  0x34   : > { %433 = vadd.xlane.f32.xlu1 %v423_v12  ;;  %429 = vadd.xlane.f32.xlu0 %v421_v13  ;;  %v426_v19 = vmul.f32 %v369_v17, %v369_v17  ;;  %v427_v24 = vmul.f32 %v370_v22, %v370_v22  ;;  %v373_v50 = vld [vmem:[#allocation2 + $0x8] sm:$0xff]  ;;  %v375_v61 = vld [vmem:[#allocation2 + $0x18] sm:$0xff]  ;;  %v374_v0 = vld [vmem:[#allocation2 + $0x10] sm:$0xff] }
  0x35   : > { %v377_v6 = vld [vmem:[#allocation2 + $0x28] sm:$0xff]  ;;  %v376_v7 = vld [vmem:[#allocation2 + $0x20] sm:$0xff] }
  0x36   : > { %v418_v37 = vld [vmem:[#allocation3 + $0x28] sm:$0xff]  ;;  %v417_v38 = vld [vmem:[#allocation3 + $0x20] sm:$0xff] }
  0x37   : > { %v413_v26 = vld [vmem:[#allocation3] sm:$0xff]  ;;  %v414_v32 = vld [vmem:[#allocation3 + $0x8] sm:$0xff]  ;;  %v420_v43 = vld [vmem:[#allocation3 + $0x38] sm:$0xff] }
  0x38   : > { %435 = vadd.xlane.f32.xlu1 %v424_v15  ;;  %431 = vadd.xlane.f32.xlu0 %v422_v16  ;;  %v415_v25 = vld [vmem:[#allocation3 + $0x10] sm:$0xff]  ;;  %v416_v31 = vld [vmem:[#allocation3 + $0x18] sm:$0xff] }
  0x39   : > { %v419_v44 = vld [vmem:[#allocation3 + $0x30] sm:$0xff]  ;;  %v379_v16 = vld [vmem:[#allocation2 + $0x38] sm:$0xff] }
  0x3c   : > { %439 = vadd.xlane.f32.xlu1 %v426_v19  ;;  %437 = vadd.xlane.f32.xlu0 %v425_v20 }
  0x40   : > { %443 = vadd.xlane.f32.xlu1 %v428_v23  ;;  %441 = vadd.xlane.f32.xlu0 %v427_v24 }
  0x44   : > { %382 = vadd.xlane.f32.xlu1 %v365_v14  ;;  %380 = vadd.xlane.f32.xlu0 %v364_v10  ;;  %v517_v10 = vld [vmem:[%s1630_s4] sm:$0xff] }
  0x45   : > { %1099 = vmatprep.mubr.msk.f32.mxu0 %vm521_vm2, %v517_v10  ;;  %v802_v10 = vld [vmem:[%s1627_s1 + $0x28] sm:$0xff] }
  0x48   : > { %386 = vadd.xlane.f32.xlu1 %v367_v11  ;;  %384 = vadd.xlane.f32.xlu0 %v366_v9 }
  0x4c   : > { %390 = vadd.xlane.f32.xlu1 %v369_v17  ;;  %388 = vadd.xlane.f32.xlu0 %v368_v18  ;;  %v378_v17 = vld [vmem:[#allocation2 + $0x30] sm:$0xff] }
  0x50   : > { %394 = vadd.xlane.f32.xlu1 %v371_v21  ;;  %392 = vadd.xlane.f32.xlu0 %v370_v22 }
  0xc1   : > { %v434_v27 = vpop.xlane.xlu1 %433  ;;  %v430_v28 = vpop.xlane.xlu0 %429 }
  0xc2   : > { %v447_v29 = vadd.f32 %v434_v27, %v415_v25  ;;  %v445_v30 = vadd.f32 %v430_v28, %v413_v26 }
  0xc4   : > { %455 = vst.msk [vmem:[#allocation3 + $0x10] sm:$0xff] %vm404_vm1, %v447_v29  ;;  %453 = vst.msk [vmem:[#allocation3] sm:$0xff] %vm404_vm1, %v445_v30 }
  0xc5   : > { %v436_v33 = vpop.xlane.xlu1 %435  ;;  %v432_v34 = vpop.xlane.xlu0 %431 }
  0xc6   : > { %v448_v35 = vadd.f32 %v436_v33, %v416_v31  ;;  %v446_v36 = vadd.f32 %v432_v34, %v414_v32 }
  0xc8   : > { %456 = vst.msk [vmem:[#allocation3 + $0x18] sm:$0xff] %vm404_vm1, %v448_v35  ;;  %454 = vst.msk [vmem:[#allocation3 + $0x8] sm:$0xff] %vm404_vm1, %v446_v36 }
  0xc9   : > { %v440_v39 = vpop.xlane.xlu1 %439  ;;  %v438_v40 = vpop.xlane.xlu0 %437 }
  0xca   : > { %v450_v41 = vadd.f32 %v440_v39, %v418_v37  ;;  %v449_v42 = vadd.f32 %v438_v40, %v417_v38 }
  0xcb   : > { %v471_v47 = vld [vmem:[#allocation3 + $0x10] sm:$0xff]  ;;  %v469_v53 = vld [vmem:[#allocation3] sm:$0xff] }
  0xcc   : > { %458 = vst.msk [vmem:[#allocation3 + $0x28] sm:$0xff] %vm404_vm1, %v450_v41  ;;  %457 = vst.msk [vmem:[#allocation3 + $0x20] sm:$0xff] %vm404_vm1, %v449_v42 }
  0xcd   : > { %v444_v45 = vpop.xlane.xlu1 %443  ;;  %v442_v46 = vpop.xlane.xlu0 %441 }
  0xce   : > { %v452_v48 = vadd.f32 %v444_v45, %v420_v43  ;;  %v451_v49 = vadd.f32 %v442_v46, %v419_v44 }
  0xcf   : > { %v472_v52 = vld [vmem:[#allocation3 + $0x18] sm:$0xff]  ;;  %v470_v54 = vld [vmem:[#allocation3 + $0x8] sm:$0xff] }
  0xd0   : > { %460 = vst.msk [vmem:[#allocation3 + $0x38] sm:$0xff] %vm404_vm1, %v452_v48  ;;  %459 = vst.msk [vmem:[#allocation3 + $0x30] sm:$0xff] %vm404_vm1, %v451_v49  ;;  %v1213_v55 = vpack.i.bf16 %v472_v52, %v471_v47  ;;  %v1208_v56 = vpack.i.bf16 %v470_v54, %v469_v53  ;;  %v518_v54 = vld [vmem:[%s1630_s4 + $0x8] sm:$0xff] }
  0xd1   : > { %v383_v57 = vpop.xlane.xlu1 %382  ;;  %v381_v58 = vpop.xlane.xlu0 %380 }
  0xd2   : > { %1214 = vrot.lane.b32.xlu1 %v1213_v55, %s1293_s21  ;;  %1209 = vrot.lane.b32.xlu0 %v1208_v56, %s1293_s21  ;;  %v397_v59 = vadd.f32 %v383_v57, %v373_v50  ;;  %v396_v60 = vadd.f32 %v381_v58, %v372_v51  ;;  %v519_v55 = vld [vmem:[%s1630_s4 + $0x10] sm:$0xff]  ;;  %v520_v56 = vld [vmem:[%s1630_s4 + $0x18] sm:$0xff] }
  0xd3   : > { %v473_v62 = vld [vmem:[#allocation3 + $0x20] sm:$0xff]  ;;  %v474_v63 = vld [vmem:[#allocation3 + $0x28] sm:$0xff] }
  0xd4   : > { %v1218_v1 = vpack.i.bf16 %v474_v63, %v473_v62  ;;  %406 = vst.msk [vmem:[#allocation2 + $0x8] sm:$0xff] %vm404_vm1, %v397_v59  ;;  %405 = vst.msk [vmem:[#allocation2] sm:$0xff] %vm404_vm1, %v396_v60 }
  0xd5   : > { %v387_v2 = vpop.xlane.xlu1 %386  ;;  %v385_v3 = vpop.xlane.xlu0 %384 }
  0xd6   : > { %1219 = vrot.lane.b32.xlu1 %v1218_v1, %s1293_s21  ;;  %v399_v4 = vadd.f32 %v387_v2, %v375_v61  ;;  %v398_v5 = vadd.f32 %v385_v3, %v374_v0 }
  0xd7   : > { %v475_v8 = vld [vmem:[#allocation3 + $0x30] sm:$0xff]  ;;  %v476_v9 = vld [vmem:[#allocation3 + $0x38] sm:$0xff] }
  0xd8   : > { %v1223_v11 = vpack.i.bf16 %v476_v9, %v475_v8  ;;  %408 = vst.msk [vmem:[#allocation2 + $0x18] sm:$0xff] %vm404_vm1, %v399_v4  ;;  %407 = vst.msk [vmem:[#allocation2 + $0x10] sm:$0xff] %vm404_vm1, %v398_v5  ;;  %v655_v5 = vld [vmem:[%s1629_s3] sm:$0xff]  ;;  %v800_v8 = vld [vmem:[%s1627_s1 + $0x18] sm:$0xff] }
  0xd9   : > { %v391_v12 = vpop.xlane.xlu1 %390  ;;  %v389_v13 = vpop.xlane.xlu0 %388  ;;  %1113 = vmatprep.mubr.msk.f32.mxu1 %vm667_vm3, %v655_v5  ;;  %v799_v9 = vld [vmem:[%s1627_s1 + $0x10] sm:$0xff] }
  0xda   : > { %1224 = vrot.lane.b32.xlu1 %v1223_v11, %s1293_s21  ;;  %v401_v14 = vadd.f32 %v391_v12, %v377_v6  ;;  %v400_v15 = vadd.f32 %v389_v13, %v376_v7  ;;  %v798_v6 = vld [vmem:[%s1627_s1 + $0x8] sm:$0xff]  ;;  %v797_v7 = vld [vmem:[%s1627_s1] sm:$0xff]  ;;  %v804_v12 = vld [vmem:[%s1627_s1 + $0x38] sm:$0xff] }
  0xdb   : > { %v461_v29 = vld [vmem:[#allocation2] sm:$0xff]  ;;  %v462_v30 = vld [vmem:[#allocation2 + $0x8] sm:$0xff]  ;;  %v803_v13 = vld [vmem:[%s1627_s1 + $0x30] sm:$0xff] }
  0xdc   : > { %410 = vst.msk [vmem:[#allocation2 + $0x28] sm:$0xff] %vm404_vm1, %v401_v14  ;;  %409 = vst.msk [vmem:[#allocation2 + $0x20] sm:$0xff] %vm404_vm1, %v400_v15  ;;  %v801_v11 = vld [vmem:[%s1627_s1 + $0x20] sm:$0xff] }
  0xdd   : > { %v395_v18 = vpop.xlane.xlu1 %394  ;;  %v393_v19 = vpop.xlane.xlu0 %392 }
  0xde   : > { %v403_v20 = vadd.f32 %v395_v18, %v379_v16  ;;  %v402_v21 = vadd.f32 %v393_v19, %v378_v17 }
  0xdf   : > { %v464_v24 = vld [vmem:[#allocation2 + $0x18] sm:$0xff]  ;;  %v463_v31 = vld [vmem:[#allocation2 + $0x10] sm:$0xff] }
  0xe0   : > { %412 = vst.msk [vmem:[#allocation2 + $0x38] sm:$0xff] %vm404_vm1, %v403_v20  ;;  %411 = vst.msk [vmem:[#allocation2 + $0x30] sm:$0xff] %vm404_vm1, %v402_v21 }
  0xe3   : > { %v466_v38 = vld [vmem:[#allocation2 + $0x28] sm:$0xff]  ;;  %v465_v42 = vld [vmem:[#allocation2 + $0x20] sm:$0xff] }
  0xe7   : > { %v468_v46 = vld [vmem:[#allocation2 + $0x38] sm:$0xff]  ;;  %v467_v50 = vld [vmem:[#allocation2 + $0x30] sm:$0xff] }
 0x144   : > { %v1215_v22 = vpop.permute.xlu1 %1214  ;;  %v1210_v23 = vpop.permute.xlu0 %1209 }
 0x145   : > { %v1217_v25 = vunpack.i.h.bf16 %v1215_v22  ;;  %v1216_v26 = vunpack.i.l.bf16 %v1215_v22  ;;  %v1212_v27 = vunpack.i.h.bf16 %v1210_v23  ;;  %v1211_v28 = vunpack.i.l.bf16 %v1210_v23 }
 0x147   : > { %v509_v32 = vsel %vm404_vm1, %v461_v29, %v1211_v28  ;;  %v510_v33 = vsel %vm404_vm1, %v462_v30, %v1212_v27  ;;  %v511_v34 = vsel %vm404_vm1, %v463_v31, %v1216_v26  ;;  %v512_v35 = vsel %vm404_vm1, %v464_v24, %v1217_v25 }
 0x148   : > { %v1220_v36 = vpop.permute.xlu1 %1219  ;;  %v1125_v37 = vpack.c.bf16 %v510_v33, %v509_v32  ;;  %v1129_v41 = vpack.c.bf16 %v512_v35, %v511_v34 }
 0x149   : > { %v1222_v39 = vunpack.i.h.bf16 %v1220_v36  ;;  %v1221_v40 = vunpack.i.l.bf16 %v1220_v36  ;;  %v656_v36 = vld [vmem:[%s1629_s3 + $0x8] sm:$0xff] }
 0x14a   : > { %1126 = vmatprep.subr.bf16.mxu0 %v1125_v37 }
 0x14b   : > { %1128 = vmatpush3.bf16.msra.mxu0 %v1125_v37  ;;  %v513_v43 = vsel %vm404_vm1, %v465_v42, %v1221_v40  ;;  %v514_v44 = vsel %vm404_vm1, %v466_v38, %v1222_v39  ;;  %v657_v37 = vld [vmem:[%s1629_s3 + $0x10] sm:$0xff]  ;;  %v658_v38 = vld [vmem:[%s1629_s3 + $0x18] sm:$0xff]  ;;  %v659_v39 = vld [vmem:[%s1629_s3 + $0x20] sm:$0xff] }
 0x14c   : > { %v1225_v45 = vpop.permute.xlu1 %1224  ;;  %1130 = vmatprep.subr.bf16.mxu0 %v1129_v41  ;;  %v1133_v49 = vpack.c.bf16 %v514_v44, %v513_v43  ;;  %v660_v40 = vld [vmem:[%s1629_s3 + $0x28] sm:$0xff]  ;;  %v662_v42 = vld [vmem:[%s1629_s3 + $0x38] sm:$0xff] }
 0x14d   : > { %v1227_v47 = vunpack.i.h.bf16 %v1225_v45  ;;  %v1226_v48 = vunpack.i.l.bf16 %v1225_v45 }
 0x14f   : > { %1132 = vmatpush3.bf16.msra.mxu0 %v1129_v41  ;;  %v515_v51 = vsel %vm404_vm1, %v467_v50, %v1226_v48  ;;  %v516_v52 = vsel %vm404_vm1, %v468_v46, %v1227_v47  ;;  %v661_v41 = vld [vmem:[%s1629_s3 + $0x30] sm:$0xff] }
 0x150   : > { %1134 = vmatprep.subr.bf16.mxu0 %v1133_v49  ;;  %v1137_v53 = vpack.c.bf16 %v516_v52, %v515_v51 }
 0x153   : > { %1136 = vmatpush3.bf16.msra.mxu0 %v1133_v49 }
 0x154   : > { %1138 = vmatprep.subr.bf16.mxu0 %v1137_v53 }
 0x157   : > { %1140 = vmatpush3.bf16.msra.mxu0 %v1137_v53 }
 0x15a   : > { %1100 = vmatmul.mubr.msk.f32.vlgmr.msra.gmra.mrb[0].mxu0 %vm521_vm2, %v518_v54 }
 0x15b   : > { %1102 = vmatprep.mubr.msk.f32.mxu0 %vm521_vm2, %v519_v55 }
 0x15e   : > { %1103 = vmatmul.mubr.msk.f32.gmra.mrb[2].mxu0 %vm521_vm2, %v520_v56 }
 0x22d   : > { %v1101_v57 = vpop.f32.mrb[0].mxu0 }
 0x22e   : > { %v620_v58 = vmul.f32 0.001953125, %v1101_v57  ;;  %v600_v59 = vpop.f32.mrb[1].mxu0 }
 0x22f   : > { %v619_v60 = vmul.f32 0.001953125, %v600_v59 }
 0x230   : > { %v624_v61 = vmul.f32 %v620_v58, %v620_v58 }
 0x231   : > { %v1104_v62 = vpop.f32.mrb[2].mxu0  ;;  %v623_v63 = vmul.f32 %v619_v60, %v619_v60 }
 0x232   : > { %v622_v0 = vmul.f32 0.001953125, %v1104_v62  ;;  %633 = vrot.lane.b32.xlu1 %v624_v61, %s1293_s21  ;;  %v610_v1 = vpop.f32.mrb[3].mxu0 }
 0x233   : > { %v621_v2 = vmul.f32 0.001953125, %v610_v1  ;;  %631 = vrot.lane.b32.xlu0 %v623_v63, %s1293_s21 }
 0x234   : > { %v626_v3 = vmul.f32 %v622_v0, %v622_v0 }
 0x235   : > { %v625_v4 = vmul.f32 %v621_v2, %v621_v2 }
 0x236   : > { %637 = vrot.lane.b32.xlu1 %v626_v3, %s1293_s21  ;;  %v846_v3 = vld [vmem:[%s1628_s2 + $0x8] sm:$0xff] }
 0x237   : > { %635 = vrot.lane.b32.xlu0 %v625_v4, %s1293_s21 }
 0x23a   : > { %815 = vrot.lane.b32.xlu1 %v798_v6, %s1293_s21  ;;  %v845_v6 = vld [vmem:[%s1628_s2] sm:$0xff] }
 0x23b   : > { %813 = vrot.lane.b32.xlu0 %v797_v7, %s1293_s21 }
 0x23e   : > { %819 = vrot.lane.b32.xlu1 %v800_v8, %s1293_s21 }
 0x23f   : > { %817 = vrot.lane.b32.xlu0 %v799_v9, %s1293_s21 }
 0x242   : > { %823 = vrot.lane.b32.xlu1 %v802_v10, %s1293_s21 }
 0x243   : > { %821 = vrot.lane.b32.xlu0 %v801_v11, %s1293_s21  ;;  %v848_v11 = vld [vmem:[%s1628_s2 + $0x18] sm:$0xff] }
 0x246   : > { %827 = vrot.lane.b32.xlu1 %v804_v12, %s1293_s21 }
 0x247   : > { %825 = vrot.lane.b32.xlu0 %v803_v13, %s1293_s21  ;;  %s1294_s21 = smov 127  }
 0x2a4   : > { %v634_v14 = vpop.permute.xlu1 %633 }
 0x2a5   : > { %v644_v15 = vsub.f32 %v620_v58, %v634_v14  ;;  %v632_v16 = vpop.permute.xlu0 %631  ;;  %v847_v14 = vld [vmem:[%s1628_s2 + $0x10] sm:$0xff] }
 0x2a6   : > { %v643_v17 = vsub.f32 %v619_v60, %v632_v16 }
 0x2a7   : > { %v648_v18 = vadd.f32 1e-05, %v644_v15 }
 0x2a8   : > { %v647_v19 = vadd.f32 1e-05, %v643_v17  ;;  %v638_v20 = vpop.permute.xlu1 %637 }
 0x2a9   : > { %1228 = vrsqrt.f32 %v648_v18  ;;  %v646_v21 = vsub.f32 %v622_v0, %v638_v20  ;;  %v636_v22 = vpop.permute.xlu0 %635 }
 0x2aa   : > { %1230 = vrsqrt.f32 %v647_v19  ;;  %v645_v23 = vsub.f32 %v621_v2, %v636_v22  ;;  %v850_v19 = vld [vmem:[%s1628_s2 + $0x28] sm:$0xff]  ;;  %v849_v22 = vld [vmem:[%s1628_s2 + $0x20] sm:$0xff] }
 0x2ab   : > { %v650_v24 = vadd.f32 1e-05, %v646_v21 }
 0x2ac   : > { %v649_v25 = vadd.f32 1e-05, %v645_v23  ;;  %v816_v43 = vpop.permute.xlu1 %815 }
 0x2ad   : > { %1232 = vrsqrt.f32 %v650_v24  ;;  %v814_v44 = vpop.permute.xlu0 %813 }
 0x2ae   : > { %1234 = vrsqrt.f32 %v649_v25 }
 0x2b0   : > { %v820_v45 = vpop.permute.xlu1 %819 }
 0x2b1   : > { %v818_v46 = vpop.permute.xlu0 %817 }
 0x2b3   : > { %v1229_v26 = vpop.eup %1228 }
 0x2b4   : > { %v1231_v27 = vpop.eup %1230  ;;  %v664_v28 = vsel %vm404_vm1, %v620_v58, %v1229_v26  ;;  %v824_v52 = vpop.permute.xlu1 %823 }
 0x2b5   : > { %v663_v29 = vsel %vm404_vm1, %v619_v60, %v1231_v27  ;;  %v822_v55 = vpop.permute.xlu0 %821  ;;  %v852_v27 = vld [vmem:[%s1628_s2 + $0x38] sm:$0xff] }
 0x2b6   : > { %v1141_v30 = vpack.c.bf16 %v664_v28, %v663_v29 }
 0x2b7   : > { %v1233_v31 = vpop.eup %1232 }
 0x2b8   : > { %v1235_v32 = vpop.eup %1234  ;;  %1142 = vmatprep.subr.bf16.mxu1 %v1141_v30  ;;  %v666_v33 = vsel %vm404_vm1, %v622_v0, %v1233_v31  ;;  %v828_v61 = vpop.permute.xlu1 %827 }
 0x2b9   : > { %1144 = vmatpush3.bf16.msra.mxu1 %v1141_v30  ;;  %v665_v34 = vsel %vm404_vm1, %v621_v2, %v1235_v32  ;;  %v826_v62 = vpop.permute.xlu0 %825  ;;  %v851_v30 = vld [vmem:[%s1628_s2 + $0x30] sm:$0xff] }
 0x2ba   : > { %v1145_v35 = vpack.c.bf16 %v666_v33, %v665_v34 }
 0x2bc   : > { %1146 = vmatprep.subr.bf16.mxu1 %v1145_v35 }
 0x2bd   : > { %1148 = vmatpush3.bf16.msra.mxu1 %v1145_v35 }
 0x2c0   : > { %1114 = vmatmul.mubr.msk.f32.vlgmr.msra.gmra.mrb[0].mxu1 %vm667_vm3, %v656_v36 }
 0x2c1   : > { %1116 = vmatprep.mubr.msk.f32.mxu1 %vm667_vm3, %v657_v37 }
 0x2c4   : > { %1117 = vmatmul.mubr.msk.f32.gmra.mrb[2].mxu1 %vm667_vm3, %v658_v38 }
 0x2c5   : > { %1119 = vmatprep.mubr.msk.f32.mxu1 %vm667_vm3, %v659_v39 }
 0x2c8   : > { %1120 = vmatmul.mubr.msk.f32.gmra.mrb[4].mxu1 %vm667_vm3, %v660_v40 }
 0x2c9   : > { %1122 = vmatprep.mubr.msk.f32.mxu1 %vm667_vm3, %v661_v41 }
 0x2cc   : > { %1123 = vmatmul.mubr.msk.f32.gmra.mrb[6].mxu1 %vm667_vm3, %v662_v42 }
 0x393   : > { %v1115_v47 = vpop.f32.mrb[0].mxu1 }
 0x394   : > { %v838_v48 = vmul.f32 %v1115_v47, %v816_v43  ;;  %v758_v49 = vpop.f32.mrb[1].mxu1 }
 0x395   : > { %v837_v50 = vmul.f32 %v814_v44, %v758_v49 }
 0x396   : > { %863 = vrot.lane.b32.xlu1 %v838_v48, %s1294_s21 }
 0x397   : > { %v1118_v51 = vpop.f32.mrb[2].mxu1  ;;  %861 = vrot.lane.b32.xlu0 %v837_v50, %s1294_s21 }
 0x398   : > { %v840_v53 = vmul.f32 %v1118_v51, %v820_v45  ;;  %v768_v54 = vpop.f32.mrb[3].mxu1 }
 0x399   : > { %v839_v56 = vmul.f32 %v818_v46, %v768_v54 }
 0x39a   : > { %867 = vrot.lane.b32.xlu1 %v840_v53, %s1294_s21 }
 0x39b   : > { %v1121_v57 = vpop.f32.mrb[4].mxu1  ;;  %865 = vrot.lane.b32.xlu0 %v839_v56, %s1294_s21 }
 0x39c   : > { %v842_v58 = vmul.f32 %v1121_v57, %v824_v52  ;;  %v778_v59 = vpop.f32.mrb[5].mxu1 }
 0x39d   : > { %v841_v60 = vmul.f32 %v822_v55, %v778_v59 }
 0x39e   : > { %871 = vrot.lane.b32.xlu1 %v842_v58, %s1294_s21 }
 0x39f   : > { %v1124_v63 = vpop.f32.mrb[6].mxu1  ;;  %869 = vrot.lane.b32.xlu0 %v841_v60, %s1294_s21 }
 0x3a0   : > { %v844_v0 = vmul.f32 %v1124_v63, %v828_v61  ;;  %v788_v1 = vpop.f32.mrb[7].mxu1 }
 0x3a1   : > { %v843_v2 = vmul.f32 %v826_v62, %v788_v1 }
 0x3a2   : > { %875 = vrot.lane.b32.xlu1 %v844_v0, %s1294_s21 }
 0x3a3   : > { %873 = vrot.lane.b32.xlu0 %v843_v2, %s1294_s21 }
 0x408   : > { %v864_v4 = vpop.permute.xlu1 %863 }
 0x409   : > { %v886_v5 = vmul.f32 %v1115_v47, %v864_v4  ;;  %v862_v7 = vpop.permute.xlu0 %861  ;;  %906 = vst.msk [vmem:[%s1398_s11 + $0x8] sm:$0xff] (!%p1054_p12), %vm404_vm1, %v864_v4 }
 0x40a   : > { %v885_v8 = vmul.f32 %v862_v7, %v758_v49  ;;  %905 = vst.msk [vmem:[%s1398_s11] sm:$0xff] (!%p1054_p12), %vm404_vm1, %v862_v7 }
 0x40b   : > { %v894_v9 = vsub.f32 %v846_v3, %v886_v5 }
 0x40c   : > { %v893_v10 = vsub.f32 %v845_v6, %v885_v8  ;;  %v868_v12 = vpop.permute.xlu1 %867 }
 0x40d   : > { %v888_v13 = vmul.f32 %v1118_v51, %v868_v12  ;;  %v866_v15 = vpop.permute.xlu0 %865  ;;  %908 = vst.msk [vmem:[%s1398_s11 + $0x18] sm:$0xff] (!%p1054_p12), %vm404_vm1, %v868_v12  ;;  %914 = vst.msk [vmem:[%s1403_s14 + $0x8] sm:$0xff] (!%p1054_p12), %vm404_vm1, %v894_v9 }
 0x40e   : > { %v887_v16 = vmul.f32 %v866_v15, %v768_v54  ;;  %907 = vst.msk [vmem:[%s1398_s11 + $0x10] sm:$0xff] (!%p1054_p12), %vm404_vm1, %v866_v15  ;;  %913 = vst.msk [vmem:[%s1403_s14] sm:$0xff] (!%p1054_p12), %vm404_vm1, %v893_v10 }
 0x40f   : > { %v896_v17 = vsub.f32 %v848_v11, %v888_v13 }
 0x410   : > { %v895_v18 = vsub.f32 %v847_v14, %v887_v16  ;;  %v872_v20 = vpop.permute.xlu1 %871 }
 0x411   : > { %v890_v21 = vmul.f32 %v1121_v57, %v872_v20  ;;  %v870_v23 = vpop.permute.xlu0 %869  ;;  %910 = vst.msk [vmem:[%s1398_s11 + $0x28] sm:$0xff] (!%p1054_p12), %vm404_vm1, %v872_v20  ;;  %916 = vst.msk [vmem:[%s1403_s14 + $0x18] sm:$0xff] (!%p1054_p12), %vm404_vm1, %v896_v17 }
 0x412   : > { %v889_v24 = vmul.f32 %v870_v23, %v778_v59  ;;  %904 = sbr.rel (%p1054_p12) target bundleno = 1051 (0x41b), region = 86  ;;  %909 = vst.msk [vmem:[%s1398_s11 + $0x20] sm:$0xff] (!%p1054_p12), %vm404_vm1, %v870_v23  ;;  %915 = vst.msk [vmem:[%s1403_s14 + $0x10] sm:$0xff] (!%p1054_p12), %vm404_vm1, %v895_v18 }
 0x413   : > { %v898_v25 = vsub.f32 %v850_v19, %v890_v21 }
 0x414   : > { %v897_v26 = vsub.f32 %v849_v22, %v889_v24  ;;  %v876_v28 = vpop.permute.xlu1 %875 }
 0x415   : > { %v892_v29 = vmul.f32 %v1124_v63, %v876_v28  ;;  %v874_v31 = vpop.permute.xlu0 %873  ;;  %912 = vst.msk [vmem:[%s1398_s11 + $0x38] sm:$0xff] (!%p1054_p12), %vm404_vm1, %v876_v28  ;;  %918 = vst.msk [vmem:[%s1403_s14 + $0x28] sm:$0xff] (!%p1054_p12), %vm404_vm1, %v898_v25 }
 0x416   : > { %v891_v32 = vmul.f32 %v874_v31, %v788_v1  ;;  %911 = vst.msk [vmem:[%s1398_s11 + $0x30] sm:$0xff] (!%p1054_p12), %vm404_vm1, %v874_v31  ;;  %917 = vst.msk [vmem:[%s1403_s14 + $0x20] sm:$0xff] (!%p1054_p12), %vm404_vm1, %v897_v26 }
 0x417   : > { %v900_v33 = vsub.f32 %v852_v27, %v892_v29 }
 0x418   : > { %v899_v34 = vsub.f32 %v851_v30, %v891_v32 }
 0x419   : > { %920 = vst.msk [vmem:[%s1403_s14 + $0x38] sm:$0xff] %vm404_vm1, %v900_v33 }
 0x41a   : > { %919 = vst.msk [vmem:[%s1403_s14 + $0x30] sm:$0xff] %vm404_vm1, %v899_v34 }
 0x41b PF: > { %s17_s27 = sadd.s32 1, %s1290_s27   ;;  %s1633_s21 = smov %s1270_s22 }
 0x41c   : > { %p14_p13 = scmp.ge.s32.totalorder %s17_s27, 6   ;;  %s1634_s22 = smov %s1381_s10 }
 0x41d   : > { %s1635_s23 = smov %s1282_s25  ;;  %s1636_s24 = smov %s1286_s26 }
 0x41e   : > { %s1637_s25 = smov %s1640_s28  ;;  %s1638_s26 = smov %s1644_s29 }
 0x41f   :  { %16 = sbr.rel (!%p14_p13) target bundleno = 4 (0x4), region = 133 }

// kernel: unet_output_layer.3
= control target key start
LH: loop header
LB: loop body
LE: loop exit
PB: predicated region body
PF: predicated region fallthrough
CT: control target
= control target key end

     0   :  { %s1874_s0 = inlined_call_operand.vmem [shape: f32[2,64,256], index: 0, kind: input, shape index: {}]   ;;  %s1875_s1 = inlined_call_operand.vmem [shape: f32[2,2,64,16], index: 1, kind: input, shape index: {}]   ;;  %s1876_s2 = inlined_call_operand.vmem [shape: f32[2,2,64,16], index: 2, kind: input, shape index: {}]   ;;  %s1877_s3 = inlined_call_operand.vmem [shape: f32[2,64,1], index: 3, kind: input, shape index: {}]   ;;  %s1878_s4 = inlined_call_operand.vmem [shape: f32[2,64,1], index: 4, kind: input, shape index: {}]   ;;  %s1879_s5 = inlined_call_operand.vmem [shape: bf16[72,64], index: 5, kind: input, shape index: {}]   ;;  %s1880_s6 = inlined_call_operand.vmem [shape: f32[4,1], index: 6, kind: input, shape index: {}]   ;;  %s1881_s7 = inlined_call_operand.vmem [shape: bf16[2,128], index: 7, kind: input, shape index: {}]   ;;  %s1882_s8 = inlined_call_operand.vmem [shape: f32[2,4,256], index: 8, kind: output, shape index: {}]  }
   0x1   :  { %1883 = sst [smem:[#allocation3_spill]] %s1874_s0 }
   0x2   :  { %s1593_s27 = smov 0   ;;  %s1595_s28 = smov 0  }
   0x3   :  { %s1597_s29 = smov 0   ;;  %s1599_s30 = smov 0  }
   0x4   :  { %s1601_s9 = smov 0   ;;  %s1603_s10 = smov 0  }
   0x5   :  { %s1605_s11 = smov 0  }
   0x6 LB: > { %s27_s12 = sadd.s32 1, %s1527_s9  ;;  %s30_s13 = sadd.s32 1, %s1531_s10  ;;  %s1535_s11 = sphi %s1605_s11, %s18_s11   ;;  %s1531_s10 = sphi %s1603_s10, %s1890_s10   ;;  %s1527_s9 = sphi %s1601_s9, %s1889_s9   ;;  %s1523_s30 = sphi %s1599_s30, %s1888_s30   ;;  %s1519_s29 = sphi %s1597_s29, %s1887_s29   ;;  %s1515_s28 = sphi %s1595_s28, %s1886_s28   ;;  %s1511_s27 = sphi %s1593_s27, %s1885_s27  }
   0x7   : > { %p28_p0 = scmp.ge.s32.totalorder %s27_s12, 2  ;;  %p46_p1 = scmp.ne.s32.totalorder %s1515_s28, %s1511_s27 }
   0x8   : > { %p47_p2 = scmp.eq.s32.totalorder %s1535_s11, 0  ;;  %s39_s17 = sadd.s32 1, %s1515_s28 }
   0x9   : > { %s1892_s12 = smov (%p28_p0, %s27_s12), 0  ;;  %s1894_s13 = smov (!%p28_p0, %s30_s13), %s1531_s10 }
   0xa   : > { %p48_p3 = por %p47_p2, %p46_p1  ;;  %p32_p4 = scmp.ge.s32.totalorder %s1894_s13, 2 }
   0xb   : > { %s35_s14 = ssub.s32 %s1527_s9, %s1892_s12  ;;  %p1307_p6 = scmp.ge.s32.totalorder %s1535_s11, 4 }
   0xc   : > { %s1896_s13 = smov (%p32_p4, %s1894_s13), 0 }
   0xd   : > { %s34_s15 = ssub.s32 %s1531_s10, %s1896_s13  ;;  %280 = sbr.rel (%p1307_p6) target bundleno = 34 (0x22), region = 28 }
   0xe   : > { %s36_s16 = sor.u32 %s35_s14, %s34_s15 }
   0xf   : > { %p37_p5 = scmp.eq.s32.totalorder %s36_s16, 0 }
  0x11   : > { %s1644_s18 = scalar_select %p37_p5, %s1515_s28, %s39_s17  }
  0x14   : > { %283 = sbr.rel (!%p48_p3) target bundleno = 34 (0x22), region = 32  ;;  %s285_s19 = sand.u32 (%p48_p3), 1, %s1515_s28  }
  0x15   : > { %s1309_s20 = sshll.u32 (%p48_p3), %s1531_s10, 4  ;;  %s1308_s21 = sshll.u32 (%p48_p3), %s285_s19, 6 }
  0x16   : > { %s289_s22 = sadd.s32 (%p48_p3), %s1527_s9, %s1309_s20  ;;  %s1884_s0 = sld [smem:[#allocation3_spill]] (%p48_p3) }
  0x17   : > { %s1310_s23 = sshll.u32 (%p48_p3), %s289_s22, 3  ;;  %s287_s14 = scalar_lea.vmem (%p48_p3), [#allocation2], %s1308_s21 }
  0x1c   : > { %s291_s26 = scalar_lea.vmem %s1884_s0, %s1310_s23 }
  0x1d   : > { %v333_v0 = vld [vmem:[%s291_s26] sm:$0xff]  ;;  %v335_v1 = vld [vmem:[%s291_s26 + $0x10] sm:$0xff] }
  0x1e   : > { %v337_v2 = vld [vmem:[%s291_s26 + $0x20] sm:$0xff]  ;;  %334 = vst [vmem:[%s287_s14] sm:$0xff] %v333_v0  ;;  %336 = vst [vmem:[%s287_s14 + $0x8] sm:$0xff] %v335_v1  ;;  %v339_v3 = vld [vmem:[%s291_s26 + $0x30] sm:$0xff] }
  0x1f   : > { %338 = vst [vmem:[%s287_s14 + $0x10] sm:$0xff] %v337_v2  ;;  %v341_v4 = vld [vmem:[%s291_s26 + $0x40] sm:$0xff]  ;;  %v343_v5 = vld [vmem:[%s291_s26 + $0x50] sm:$0xff]  ;;  %340 = vst [vmem:[%s287_s14 + $0x18] sm:$0xff] %v339_v3 }
  0x20   : > { %342 = vst [vmem:[%s287_s14 + $0x20] sm:$0xff] %v341_v4  ;;  %344 = vst [vmem:[%s287_s14 + $0x28] sm:$0xff] %v343_v5  ;;  %v345_v6 = vld [vmem:[%s291_s26 + $0x60] sm:$0xff]  ;;  %v347_v7 = vld [vmem:[%s291_s26 + $0x70] sm:$0xff] }
  0x21   : > { %346 = vst [vmem:[%s287_s14 + $0x30] sm:$0xff] %v345_v6  ;;  %348 = vst [vmem:[%s287_s14 + $0x38] sm:$0xff] %v347_v7 }
  0x22 PF: > { %p1311_p7 = scmp.ge.s32.totalorder %s1535_s11, 1  ;;  %p393_p8 = scmp.lt.s32.totalorder %s1535_s11, 5 }
  0x24   : > { %p394_p9 = pnand %p1311_p7, %p393_p8 }
  0x25   : > { %p464_p10 = scmp.lt.s32.totalorder (!%p394_p9), %s1523_s30, 1  ;;  %v1537_v8 = vmov (!%p394_p9), 0   ;;  %p466_p11 = scmp.lt.s32.totalorder (!%p394_p9), %s1519_s29, 1  ;;  %vm842_vm0 = vcmask (!%p394_p9), 130048   ;;  %vm903_vm1 = vcmask (!%p394_p9), 523264   ;;  %vm1007_vm2 = vcmask (!%p394_p9), 7168  }
  0x26   : > { %397 = sbr.rel (%p394_p9) target bundleno = 975 (0x3cf), region = 86  ;;  %1427 = vset.pattern.permute.xlu1 (!%p394_p9), %v1537_v8  ;;  %1426 = vset.pattern.permute.xlu0 (!%p394_p9), %v1537_v8  ;;  %s400_s14 = sand.u32 (!%p394_p9), 1, %s1511_s27   ;;  %vm1119_vm3 = vcmask (!%p394_p9), 777216   ;;  %vm1078_vm4 = vcmask (!%p394_p9), 1039360   ;;  %vm1044_vm5 = vcmask (!%p394_p9), 121856   ;;  %vm1095_vm6 = vcmask (!%p394_p9), 924672  }
  0x27   : > { %951 = vmatprep.mubr.bf16.mxu0 (!%p394_p9), %v1537_v8  ;;  %980 = vmatprep.mubr.bf16.mxu1 (!%p394_p9), %v1537_v8  ;;  %s1312_s16 = sshll.u32 (!%p394_p9), %s400_s14, 6  ;;  %p778_p13 = scmp.gt.s32.totalorder (!%p394_p9), %s1519_s29, 0  ;;  %vm1107_vm7 = vcmask (!%p394_p9), 916480  }
  0x28   : > { %s1701_s27 = scalar_lea.vmem (!%p394_p9), [#allocation2], %s1312_s16 }
  0x29   : > { %v518_v29 = vld [vmem:[%s1701_s27] sm:$0xff] (!%p394_p9)  ;;  %v519_v31 = vld [vmem:[%s1701_s27 + $0x8] sm:$0xff] (!%p394_p9)  ;;  %v521_v49 = vld [vmem:[%s1701_s27 + $0x18] sm:$0xff] (!%p394_p9) }
  0x2a   : > { %v520_v56 = vld [vmem:[%s1701_s27 + $0x10] sm:$0xff] (!%p394_p9) }
  0x2d   : > { %s1898_s30 = smov (!%p464_p10, %s1523_s30), 1 }
  0x2e   : > { %s1349_s15 = sshll.u32 %s1898_s30, 6  ;;  %s1314_s25 = sshll.u32 %s1898_s30, 4 }
  0x2f   : > { %s1667_s19 = scalar_lea.vmem %s1878_s4, %s1349_s15  ;;  %s486_s22 = scalar_lea.vmem %s1877_s3, %s1349_s15 }
  0x30   : > { %v510_v9 = vld [vmem:[%s1667_s19] sm:$0xff]  ;;  %v511_v11 = vld [vmem:[%s1667_s19 + $0x8] sm:$0xff]  ;;  %v505_v13 = vld [vmem:[%s486_s22 + $0x18] sm:$0xff]  ;;  %s1684_s23 = scalar_select %p466_p11, %s1519_s29, 1 }
  0x31   : > { %v502_v10 = vld [vmem:[%s486_s22] sm:$0xff]  ;;  %576 = vperm.xlu1 %1427, %v510_v9   ;;  %v503_v12 = vld [vmem:[%s486_s22 + $0x8] sm:$0xff]  ;;  %v504_v14 = vld [vmem:[%s486_s22 + $0x10] sm:$0xff] }
  0x32   : > { %528 = vperm.xlu0 %1426, %v502_v10   ;;  %v513_v15 = vld [vmem:[%s1667_s19 + $0x18] sm:$0xff]  ;;  %v512_v16 = vld [vmem:[%s1667_s19 + $0x10] sm:$0xff]  ;;  %v507_v17 = vld [vmem:[%s486_s22 + $0x28] sm:$0xff]  ;;  %s1313_s24 = sshll.u32 %s1684_s23, 3 }
  0x33   : > { %v506_v18 = vld [vmem:[%s486_s22 + $0x20] sm:$0xff]  ;;  %v515_v19 = vld [vmem:[%s1667_s19 + $0x28] sm:$0xff]  ;;  %v509_v21 = vld [vmem:[%s486_s22 + $0x38] sm:$0xff]  ;;  %s470_s26 = sadd.s32 %s1314_s25, %s1313_s24 }
  0x34   : > { %v514_v20 = vld [vmem:[%s1667_s19 + $0x20] sm:$0xff]  ;;  %v508_v22 = vld [vmem:[%s486_s22 + $0x30] sm:$0xff]  ;;  %v517_v23 = vld [vmem:[%s1667_s19 + $0x38] sm:$0xff]  ;;  %s1315_s15 = sshll.u32 %s470_s26, 3 }
  0x35   : > { %581 = vperm.xlu1 %1427, %v511_v11   ;;  %v516_v24 = vld [vmem:[%s1667_s19 + $0x30] sm:$0xff]  ;;  %s1692_s21 = scalar_lea.vmem %s1875_s1, %s1315_s15  ;;  %s1697_s0 = scalar_lea.vmem %s1876_s2, %s1315_s15 }
  0x36   : > { %533 = vperm.xlu0 %1426, %v503_v12   ;;  %v658_v25 = vld [vmem:[%s1692_s21] sm:$0xff]  ;;  %v659_v32 = vld [vmem:[%s1692_s21 + $0x8] sm:$0xff]  ;;  %v661_v42 = vld [vmem:[%s1692_s21 + $0x18] sm:$0xff]  ;;  %s1722_s24 = scalar_select %p466_p11, 1.0, 0.0 }
  0x37   : > { %v718_v28 = vld [vmem:[%s1697_s0] sm:$0xff]  ;;  %v719_v33 = vld [vmem:[%s1697_s0 + $0x8] sm:$0xff]  ;;  %v660_v47 = vld [vmem:[%s1692_s21 + $0x10] sm:$0xff]  ;;  %s779_s22 = scalar_select %p778_p13, 1.0, 0.0 }
  0x38   : > { %v721_v50 = vld [vmem:[%s1697_s0 + $0x18] sm:$0xff]  ;;  %v720_v57 = vld [vmem:[%s1697_s0 + $0x10] sm:$0xff]  ;;  %v663_v10 = vld [vmem:[%s1692_s21 + $0x28] sm:$0xff]  ;;  %s794_s25 = sshrl.u32 %s1722_s24, 16  ;;  %p793_p12 = scmp.ne.f32.partialorder %s1722_s24, %s1722_s24 }
  0x39   : > { %543 = vperm.xlu1 %1427, %v505_v13   ;;  %v662_v11 = vld [vmem:[%s1692_s21 + $0x20] sm:$0xff]  ;;  %s795_s26 = sand.u32 1, %s794_s25  ;;  %s782_s19 = sshrl.u32 %s779_s22, 16 }
  0x3a   : > { %538 = vperm.xlu0 %1426, %v504_v14   ;;  %s796_s14 = sadd.s32 32767, %s795_s26  ;;  %p781_p0 = scmp.ne.f32.partialorder %s779_s22, %s779_s22 }
  0x3b   : > { %s797_s15 = sadd.s32 %s796_s14, %s1722_s24 }
  0x3c   : > { %s798_s16 = sand.u32 4294901760, %s797_s15 }
  0x3d   : > { %591 = vperm.xlu1 %1427, %v513_v15   ;;  %s1900_s16 = smov (%p793_p12, %s798_s16), 2143289344 }
  0x3e   : > { %586 = vperm.xlu0 %1426, %v512_v16  }
  0x41   : > { %553 = vperm.xlu1 %1427, %v507_v17   ;;  %v523_v17 = vld [vmem:[%s1701_s27 + $0x28] sm:$0xff] }
  0x42   : > { %548 = vperm.xlu0 %1426, %v506_v18   ;;  %v723_v18 = vld [vmem:[%s1697_s0 + $0x28] sm:$0xff] }
  0x45   : > { %601 = vperm.xlu1 %1427, %v515_v19  }
  0x46   : > { %596 = vperm.xlu0 %1426, %v514_v20  }
  0x49   : > { %563 = vperm.xlu1 %1427, %v509_v21   ;;  %v522_v21 = vld [vmem:[%s1701_s27 + $0x20] sm:$0xff] }
  0x4a   : > { %558 = vperm.xlu0 %1426, %v508_v22   ;;  %v722_v22 = vld [vmem:[%s1697_s0 + $0x20] sm:$0xff] }
  0x4d   : > { %611 = vperm.xlu1 %1427, %v517_v23  }
  0x4e   : > { %606 = vperm.xlu0 %1426, %v516_v24  }
  0xb0   : > { %v577_v26 = vpop.permute.xlu1 %576 }
  0xb1   : > { %v529_v27 = vpop.permute.xlu0 %528 }
  0xb2   : > { %v666_v30 = vmul.f32 %v658_v25, %v529_v27  ;;  %v726_v35 = vmul.f32 %v718_v28, %v529_v27  ;;  %v566_v38 = vmul.f32 %v529_v27, %v518_v29 }
  0xb4   : > { %v674_v34 = vadd.f32 %v666_v30, %v577_v26  ;;  %v582_v36 = vpop.permute.xlu1 %581  ;;  %v734_v43 = vadd.f32 %v726_v35, %v577_v26  ;;  %v614_v52 = vadd.f32 %v577_v26, %v566_v38  ;;  %v665_v38 = vld [vmem:[%s1692_s21 + $0x38] sm:$0xff] }
  0xb5   : > { %v534_v37 = vpop.permute.xlu0 %533 }
  0xb6   : > { %v567_v39 = vmul.f32 %v534_v37, %v519_v31  ;;  %v667_v40 = vmul.f32 %v659_v32, %v534_v37  ;;  %v727_v41 = vmul.f32 %v719_v33, %v534_v37 }
  0xb8   : > { %v615_v44 = vadd.f32 %v582_v36, %v567_v39  ;;  %v675_v45 = vadd.f32 %v667_v40, %v582_v36  ;;  %v735_v46 = vadd.f32 %v727_v41, %v582_v36  ;;  %v544_v48 = vpop.permute.xlu1 %543  ;;  %v664_v39 = vld [vmem:[%s1692_s21 + $0x30] sm:$0xff]  ;;  %s1538_s21 = smov 16  }
  0xb9   : > { %v539_v51 = vpop.permute.xlu0 %538  ;;  %v669_v55 = vmul.f32 %v661_v42, %v544_v48  ;;  %v569_v60 = vmul.f32 %v544_v48, %v521_v49  ;;  %v729_v61 = vmul.f32 %v721_v50, %v544_v48  ;;  %v524_v49 = vld [vmem:[%s1701_s27 + $0x30] sm:$0xff] }
  0xba   : > { %v1711_v53 = vpack.c.bf16 %v675_v45, %v674_v34  ;;  %v1713_v54 = vpack.c.bf16 %v735_v46, %v734_v43  ;;  %v668_v58 = vmul.f32 %v660_v47, %v539_v51  ;;  %v1718_v62 = vpack.c.bf16 %v615_v44, %v614_v52  ;;  %v525_v44 = vld [vmem:[%s1701_s27 + $0x38] sm:$0xff]  ;;  %v724_v50 = vld [vmem:[%s1697_s0 + $0x30] sm:$0xff]  ;;  %s783_s27 = sand.u32 1, %s782_s19  ;;  %s1545_s19 = smov 127  }
  0xbb   : > { %v568_v63 = vmul.f32 %v539_v51, %v520_v56  ;;  %v728_v0 = vmul.f32 %v720_v57, %v539_v51  ;;  %v725_v45 = vld [vmem:[%s1697_s0 + $0x38] sm:$0xff]  ;;  %s801_s0 = sshrl.u32 %s1900_s16, 16  ;;  %s784_s24 = sadd.s32 32767, %s783_s27 }
  0xbc   : > { %v1333_v59 = vmul.bf16 3216621497, %v1713_v54  ;;  %v592_v1 = vpop.permute.xlu1 %591  ;;  %v1325_v12 = vmul.bf16 3216621497, %v1718_v62  ;;  %s810_s17 = sshll.u32 %s801_s0, 16  ;;  %s785_s25 = sadd.s32 %s784_s24, %s779_s22 }
  0xbd   : > { %v587_v2 = vpop.permute.xlu0 %586  ;;  %v617_v3 = vadd.f32 %v592_v1, %v569_v60  ;;  %v677_v4 = vadd.f32 %v669_v55, %v592_v1  ;;  %v737_v5 = vadd.f32 %v729_v61, %v592_v1  ;;  %s811_s20 = sor.u32 %s810_s17, %s801_s0  ;;  %s786_s29 = sand.u32 4294901760, %s785_s25 }
  0xbe   : > { %1433 = vpow.bf16 %v1333_v59  ;;  %v616_v6 = vadd.f32 %v587_v2, %v568_v63  ;;  %v676_v7 = vadd.f32 %v668_v58, %v587_v2  ;;  %v736_v9 = vadd.f32 %v728_v0, %v587_v2  ;;  %s1902_s29 = smov (%p781_p0, %s786_s29), 2143289344  ;;  %s1540_s16 = smov 97  }
  0xbf   : > { %1435 = vpow.bf16 %v1325_v12  ;;  %s789_s26 = sshrl.u32 %s1902_s29, 16  ;;  %s1541_s0 = smov 15  }
  0xc0   : > { %v1727_v13 = vpack.c.bf16 %v617_v3, %v616_v6  ;;  %v1729_v14 = vpack.c.bf16 %v677_v4, %v676_v7  ;;  %v1731_v15 = vpack.c.bf16 %v737_v5, %v736_v9  ;;  %v554_v16 = vpop.permute.xlu1 %553  ;;  %s802_s14 = sshll.u32 %s789_s26, 16  ;;  %s1542_s17 = smov 31  }
  0xc1   : > { %v549_v19 = vpop.permute.xlu0 %548  ;;  %v671_v20 = vmul.f32 %v663_v10, %v554_v16  ;;  %v571_v26 = vmul.f32 %v554_v16, %v523_v17  ;;  %v731_v27 = vmul.f32 %v723_v18, %v554_v16  ;;  %s803_s15 = sor.u32 %s802_s14, %s789_s26  ;;  %s1544_s22 = smov 95  }
  0xc2   : > { %v1326_v23 = vmul.bf16 3216621497, %v1727_v13  ;;  %v1334_v24 = vmul.bf16 3216621497, %v1731_v15  ;;  %v670_v25 = vmul.f32 %v662_v11, %v549_v19  ;;  %v570_v28 = vmul.f32 %v549_v19, %v522_v21  ;;  %s1546_s27 = smov 113   ;;  %s1547_s24 = smov 112  }
  0xc3   : > { %v730_v29 = vmul.f32 %v722_v22, %v549_v19 }
  0xc4   : > { %1437 = vpow.bf16 %v1326_v23  ;;  %v602_v30 = vpop.permute.xlu1 %601 }
  0xc5   : > { %v597_v31 = vpop.permute.xlu0 %596  ;;  %v619_v32 = vadd.f32 %v602_v30, %v571_v26  ;;  %v679_v33 = vadd.f32 %v671_v20, %v602_v30  ;;  %v739_v34 = vadd.f32 %v731_v27, %v602_v30  ;;  %1439 = vpow.bf16 %v1334_v24 }
  0xc6   : > { %v618_v35 = vadd.f32 %v597_v31, %v570_v28  ;;  %v678_v36 = vadd.f32 %v670_v25, %v597_v31  ;;  %v738_v37 = vadd.f32 %v730_v29, %v597_v31  ;;  %v812_v28 = vstv %s811_s20  ;;  %s1543_s20 = smov 17  }
  0xc8   : > { %v1742_v40 = vpack.c.bf16 %v619_v32, %v618_v35  ;;  %v1744_v41 = vpack.c.bf16 %v679_v33, %v678_v36  ;;  %v1746_v42 = vpack.c.bf16 %v739_v34, %v738_v37  ;;  %v564_v43 = vpop.permute.xlu1 %563 }
  0xc9   : > { %v559_v46 = vpop.permute.xlu0 %558  ;;  %v1434_v47 = vpop.eup %1433  ;;  %v673_v48 = vmul.f32 %v665_v38, %v564_v43  ;;  %v573_v56 = vmul.f32 %v564_v43, %v525_v44  ;;  %v733_v57 = vmul.f32 %v725_v45, %v564_v43 }
  0xca   : > { %v1327_v51 = vmul.bf16 3216621497, %v1742_v40  ;;  %v1335_v52 = vmul.bf16 3216621497, %v1746_v42  ;;  %v672_v55 = vmul.f32 %v664_v39, %v559_v46  ;;  %v762_v58 = vadd.bf16 1065369472, %v1434_v47  ;;  %v1436_v3 = vpop.eup %1435 }
  0xcb   : > { %v572_v59 = vmul.f32 %v559_v46, %v524_v49  ;;  %v732_v60 = vmul.f32 %v724_v50, %v559_v46  ;;  %v642_v9 = vadd.bf16 1065369472, %v1436_v3 }
  0xcc   : > { %1441 = vpow.bf16 %v1327_v51  ;;  %v612_v61 = vpop.permute.xlu1 %611 }
  0xcd   : > { %v607_v63 = vpop.permute.xlu0 %606  ;;  %v621_v0 = vadd.f32 %v612_v61, %v573_v56  ;;  %v681_v1 = vadd.f32 %v673_v48, %v612_v61  ;;  %v741_v2 = vadd.f32 %v733_v57, %v612_v61  ;;  %1443 = vpow.bf16 %v1335_v52 }
  0xce   : > { %v620_v4 = vadd.f32 %v607_v63, %v572_v59  ;;  %v680_v5 = vadd.f32 %v672_v55, %v607_v63  ;;  %v740_v6 = vadd.f32 %v732_v60, %v607_v63  ;;  %1445 = vrcp.bf16 %v762_v58 }
  0xcf   : > { %v1438_v7 = vpop.eup %1437  ;;  %1447 = vrcp.bf16 %v642_v9  ;;  %v1329_v58 = vmul.bf16 3216621497, %v1711_v53  ;;  %v1331_v59 = vmul.bf16 3216621497, %v1744_v41 }
  0xd0   : > { %v625_v10 = vpack.c.bf16 %v621_v0, %v620_v4  ;;  %v1760_v11 = vpack.c.bf16 %v681_v1, %v680_v5  ;;  %v745_v12 = vpack.c.bf16 %v741_v2, %v740_v6  ;;  %v643_v16 = vadd.bf16 1065369472, %v1438_v7  ;;  %v1440_v17 = vpop.eup %1439 }
  0xd1   : > { %v763_v19 = vadd.bf16 1065369472, %v1440_v17 }
  0xd2   : > { %v1328_v18 = vmul.bf16 3216621497, %v625_v10  ;;  %1449 = vrcp.bf16 %v643_v16  ;;  %v1336_v20 = vmul.bf16 3216621497, %v745_v12  ;;  %v1332_v63 = vmul.bf16 3216621497, %v1760_v11 }
  0xd4   : > { %1451 = vpow.bf16 %v1328_v18 }
  0xd5   : > { %1453 = vpow.bf16 %v1336_v20 }
  0xd6   : > { %1455 = vrcp.bf16 %v763_v19 }
  0xd7   : > { %v1442_v21 = vpop.eup %1441 }
  0xd8   : > { %v644_v22 = vadd.bf16 1065369472, %v1442_v21  ;;  %v1444_v23 = vpop.eup %1443 }
  0xd9   : > { %v1446_v24 = vpop.eup %1445  ;;  %v764_v25 = vadd.bf16 1065369472, %v1444_v23 }
  0xda   : > { %1457 = vrcp.bf16 %v644_v22  ;;  %v767_v26 = vmul.bf16 1065369472, %v1446_v24  ;;  %v1448_v27 = vpop.eup %1447 }
  0xdb   : > { %1459 = vrcp.bf16 %v764_v25  ;;  %v647_v30 = vmul.bf16 1065369472, %v1448_v27 }
  0xdc   : > { %v774_v31 = vmul.bf16 %v767_v26, %v1713_v54 }
  0xdd   : > { %v1450_v29 = vpop.eup %1449  ;;  %v654_v34 = vmul.bf16 %v647_v30, %v1718_v62 }
  0xde   : > { %v649_v32 = vmul.bf16 1065369472, %v1450_v29  ;;  %v814_v35 = vmul.bf16 %v812_v28, %v774_v31 }
  0xdf   : > { %v1452_v33 = vpop.eup %1451  ;;  %822 = vrot.lane.b32.xlu0 %v654_v34, %s1538_s21 }
  0xe0   : > { %v645_v36 = vadd.bf16 1065369472, %v1452_v33  ;;  %v1454_v37 = vpop.eup %1453  ;;  %834 = vrot.lane.b32.xlu1 %v814_v35, %s1538_s21  ;;  %v655_v38 = vmul.bf16 %v649_v32, %v1727_v13 }
  0xe1   : > { %v1456_v39 = vpop.eup %1455  ;;  %v765_v43 = vadd.bf16 1065369472, %v1454_v37 }
  0xe2   : > { %1461 = vrcp.bf16 %v645_v36  ;;  %v769_v44 = vmul.bf16 1065369472, %v1456_v39 }
  0xe3   : > { %1463 = vrcp.bf16 %v765_v43  ;;  %824 = vrot.lane.b32.xlu0 %v655_v38, %s1538_s21 }
  0xe4   : > { %v775_v62 = vmul.bf16 %v769_v44, %v1731_v15  ;;  %1465 = vpow.bf16 %v1329_v58  ;;  %v1428_v44 = vld [vmem:[%s1879_s5] sm:$0xff]  }
  0xe5   : > { %v1458_v54 = vpop.eup %1457 }
  0xe6   : > { %v651_v45 = vmul.bf16 1065369472, %v1458_v54  ;;  %v1460_v46 = vpop.eup %1459  ;;  %v815_v47 = vmul.bf16 %v812_v28, %v775_v62  ;;  %v1429_v54 = vld [vmem:[%s1879_s5 + $0x18] sm:$0xff]   ;;  %v1431_v62 = vld [vmem:[%s1879_s5 + $0x8] sm:$0xff]  }
  0xe7   : > { %v771_v49 = vmul.bf16 1065369472, %v1460_v46  ;;  %v1011_v46 = vlaneseq }
  0xe8   : > { %v656_v48 = vmul.bf16 %v651_v45, %v1742_v40  ;;  %836 = vrot.lane.b32.xlu1 %v815_v47, %s1538_s21  ;;  %v1432_v45 = vld [vmem:[%s1879_s5 + $0x10] sm:$0xff]  }
  0xe9   : > { %v776_v13 = vmul.bf16 %v771_v49, %v1746_v42  ;;  %v1330_v42 = vmul.bf16 3216621497, %v1729_v14  ;;  %v1012_v47 = vshrl.u32 %v1011_v46, 7 }
  0xea   : > { %826 = vrot.lane.b32.xlu0 %v656_v48, %s1538_s21  ;;  %v1009_v48 = vld [vmem:[%s1881_s7] sm:$0x1] }
  0xeb   : > { %v816_v50 = vmul.bf16 %v812_v28, %v776_v13  ;;  %1467 = vpow.bf16 %v1330_v42  ;;  %v1010_v49 = vunpack.c.l.bf16 %v1009_v48  ;;  %v1013_v13 = vsub.s32 0, %v1012_v47 }
  0xec   : > { %1469 = vpow.bf16 %v1331_v59 }
  0xed   : > { %v1462_v51 = vpop.eup %1461  ;;  %838 = vrot.lane.b32.xlu1 %v816_v50, %s1538_s21  ;;  %v1030_v50 = vsub.s32 1, %v1012_v47 }
  0xee   : > { %v653_v52 = vmul.bf16 1065369472, %v1462_v51  ;;  %v1464_v55 = vpop.eup %1463 }
  0xef   : > { %v773_v56 = vmul.bf16 1065369472, %v1464_v55  ;;  %v1466_v60 = vpop.eup %1465  ;;  %v1014_v55 = vrot.slane %v1010_v49, %v1013_v13 }
  0xf0   : > { %v657_v15 = vmul.bf16 %v653_v52, %v625_v10  ;;  %v702_v61 = vadd.bf16 1065369472, %v1466_v60 }
  0xf1   : > { %v777_v57 = vmul.bf16 %v773_v56, %v745_v12  ;;  %v804_v12 = vstv %s803_s15  ;;  %s1539_s15 = smov 1  }
  0xf2   : > { %828 = vrot.lane.b32.xlu0 %v657_v15, %s1538_s21  ;;  %1471 = vrcp.bf16 %v702_v61 }
  0xf3   : > { %v817_v40 = vmul.bf16 %v812_v28, %v777_v57  ;;  %1473 = vpow.bf16 %v1332_v63  ;;  %v1817_v57 = vrot.slane %v1010_v49, %v1030_v50 }
  0xf5   : > { %840 = vrot.lane.b32.xlu1 %v817_v40, %s1538_s21 }
  0xf6   : > { %v1468_v0 = vpop.eup %1467 }
  0xf7   : > { %v703_v1 = vadd.bf16 1065369472, %v1468_v0  ;;  %v1470_v2 = vpop.eup %1469 }
  0xf8   : > { %v704_v3 = vadd.bf16 1065369472, %v1470_v2 }
  0xf9   : > { %1475 = vrcp.bf16 %v703_v1 }
  0xfa   : > { %1477 = vrcp.bf16 %v704_v3 }
  0xfd   : > { %v1472_v4 = vpop.eup %1471 }
  0xfe   : > { %v1474_v5 = vpop.eup %1473  ;;  %v707_v6 = vmul.bf16 1065369472, %v1472_v4 }
  0xff   : > { %v705_v7 = vadd.bf16 1065369472, %v1474_v5 }
 0x100   : > { %v714_v9 = vmul.bf16 %v707_v6, %v1711_v53 }
 0x101   : > { %1479 = vrcp.bf16 %v705_v7 }
 0x102   : > { %v806_v19 = vmul.bf16 %v804_v12, %v714_v9 }
 0x104   : > { %v1476_v10 = vpop.eup %1475 }
 0x105   : > { %v709_v16 = vmul.bf16 1065369472, %v1476_v10  ;;  %v1478_v21 = vpop.eup %1477 }
 0x106   : > { %v711_v53 = vmul.bf16 1065369472, %v1478_v21 }
 0x107   : > { %v715_v23 = vmul.bf16 %v709_v16, %v1729_v14 }
 0x108   : > { %v716_v27 = vmul.bf16 %v711_v53, %v1744_v41 }
 0x109   : > { %v807_v26 = vmul.bf16 %v804_v12, %v715_v23 }
 0x10a   : > { %v808_v34 = vmul.bf16 %v804_v12, %v716_v27 }
 0x10c   : > { %v1480_v29 = vpop.eup %1479 }
 0x10d   : > { %v713_v32 = vmul.bf16 1065369472, %v1480_v29 }
 0x10f   : > { %v717_v41 = vmul.bf16 %v713_v32, %v1760_v11  ;;  %v1430_v11 = vld [vmem:[%s1879_s5 + $0x20] ss:$0 sps:$4 sm:$0xff]  }
 0x111   : > { %v809_v38 = vmul.bf16 %v804_v12, %v717_v41 }
 0x151   : > { %v823_v17 = vpop.permute.xlu0 %822 }
 0x152   : > { %v835_v18 = vpop.permute.xlu1 %834  ;;  %v845_v22 = vsel %vm842_vm0, %v806_v19, %v823_v17 }
 0x153   : > { %v860_v20 = vsel %vm842_vm0, %v823_v17, %v835_v18 }
 0x154   : > { %919 = vmatprep.subr.bf16.mxu0 %v860_v20  ;;  %1351 = vmatprep.subr.bf16.mxu1 %v860_v20 }
 0x155   : > { %920 = vmatpush1.bf16.msra.mxu0 %v845_v22  ;;  %1355 = vmatpush1.bf16.msra.mxu1 %v845_v22  ;;  %v825_v24 = vpop.permute.xlu0 %824 }
 0x156   : > { %v849_v30 = vsel %vm842_vm0, %v807_v26, %v825_v24 }
 0x15a   : > { %v837_v25 = vpop.permute.xlu1 %836 }
 0x15b   : > { %v863_v28 = vsel %vm842_vm0, %v825_v24, %v837_v25 }
 0x15c   : > { %921 = vmatprep.subr.bf16.mxu0 %v863_v28  ;;  %1352 = vmatprep.subr.bf16.mxu1 %v863_v28  ;;  %v827_v31 = vpop.permute.xlu0 %826 }
 0x15d   : > { %922 = vmatpush1.bf16.msra.mxu0 %v849_v30  ;;  %1356 = vmatpush1.bf16.msra.mxu1 %v849_v30  ;;  %v853_v35 = vsel %vm842_vm0, %v808_v34, %v827_v31  ;;  %v1133_v34 = vld [vmem:[%s1880_s6] sm:$0xf] }
 0x15f   : > { %v839_v33 = vpop.permute.xlu1 %838 }
 0x160   : > { %v866_v14 = vsel %vm842_vm0, %v827_v31, %v839_v33 }
 0x161   : > { %923 = vmatprep.subr.bf16.mxu0 %v866_v14  ;;  %1353 = vmatprep.subr.bf16.mxu1 %v866_v14 }
 0x162   : > { %924 = vmatpush1.bf16.msra.mxu0 %v853_v35  ;;  %1357 = vmatpush1.bf16.msra.mxu1 %v853_v35 }
 0x164   : > { %v829_v36 = vpop.permute.xlu0 %828 }
 0x165   : > { %v857_v43 = vsel %vm842_vm0, %v809_v38, %v829_v36 }
 0x167   : > { %v841_v37 = vpop.permute.xlu1 %840 }
 0x168   : > { %v869_v39 = vsel %vm842_vm0, %v829_v36, %v841_v37 }
 0x169   : > { %925 = vmatprep.subr.bf16.mxu0 %v869_v39  ;;  %1354 = vmatprep.subr.bf16.mxu1 %v869_v39 }
 0x16a   : > { %926 = vmatpush1.bf16.msra.mxu0 %v857_v43  ;;  %1358 = vmatpush1.bf16.msra.mxu1 %v857_v43 }
 0x16d   : > { %1342 = vmatmul.mubr.msk.bf16.vlgmr.msra.gmra.mrb[0].mxu0 %vm903_vm1, %v1428_v44  ;;  %1345 = vmatmul.mubr.msk.bf16.vlgmr.msra.gmra.mrb[0].mxu1 %vm903_vm1, %v1429_v54 }
 0x16e   : > { %990 = vmatprep.mubr.bf16.mxu1 %v1537_v8  ;;  %960 = vmatprep.mubr.bf16.mxu0 %v1537_v8 }
 0x175   : > { %1346 = vmatmul.mubr.msk.bf16.gmra.mrb[4].mxu1 %vm903_vm1, %v1430_v11  ;;  %1343 = vmatmul.mubr.msk.bf16.gmra.mrb[4].mxu0 %vm903_vm1, %v1431_v62 }
 0x176   : > { %970 = vmatprep.mubr.bf16.mxu0 %v1537_v8 }
 0x17d   : > { %1344 = vmatmul.mubr.msk.bf16.gmra.mrb[8].mxu0 %vm903_vm1, %v1432_v45 }
 0x240   : > { %v953_v51 = vpop.f32.mrb[0].mxu0  ;;  %v1814_v52 = vpop.f32.mrb[0].mxu1 }
 0x241   : > { %1004 = vrot.lane.b32.xlu1 %v953_v51, %s1539_s15  ;;  %v955_v8 = vpop.f32.mrb[1].mxu0  ;;  %v984_v15 = vpop.f32.mrb[1].mxu1 }
 0x242   : > { %1000 = vrot.lane.b32.xlu0 %v955_v8, %s1540_s16  ;;  %v957_v56 = vpop.f32.mrb[2].mxu0  ;;  %v986_v40 = vpop.f32.mrb[2].mxu1 }
 0x243   : > { %v959_v58 = vpop.f32.mrb[3].mxu0  ;;  %v1819_v42 = vpop.f32.mrb[3].mxu1 }
 0x245   : > { %1051 = vrot.lane.b32.xlu1 %v1014_v55, %s1541_s0 }
 0x246   : > { %1033 = vrot.lane.b32.xlu0 %v1817_v57, %s1539_s15 }
 0x248   : > { %v992_v59 = vpop.f32.mrb[4].mxu1  ;;  %v962_v60 = vpop.f32.mrb[4].mxu0 }
 0x249   : > { %1084 = vrot.lane.b32.xlu1 %v1014_v55, %s1542_s17  ;;  %v994_v61 = vpop.f32.mrb[5].mxu1  ;;  %v964_v63 = vpop.f32.mrb[5].mxu0 }
 0x24a   : > { %1067 = vrot.lane.b32.xlu0 %v1817_v57, %s1543_s20  ;;  %v996_v0 = vpop.f32.mrb[6].mxu1  ;;  %v966_v1 = vpop.f32.mrb[6].mxu0 }
 0x24b   : > { %v997_v2 = vpop.f32.mrb[7].mxu1  ;;  %v968_v3 = vpop.f32.mrb[7].mxu0 }
 0x24d   : > { %1117 = vrot.lane.b32.xlu1 %v994_v61, %s1544_s22 }
 0x24e   : > { %1115 = vrot.lane.b32.xlu0 %v992_v59, %s1544_s22 }
 0x250   : > { %v972_v4 = vpop.f32.mrb[8].mxu0 }
 0x251   : > { %v974_v5 = vpop.f32.mrb[9].mxu0 }
 0x252   : > { %1122 = vrot.lane.b32.xlu0 %v992_v59, %s1545_s19  ;;  %v976_v6 = vpop.f32.mrb[10].mxu0 }
 0x253   : > { %v978_v7 = vpop.f32.mrb[11].mxu0 }
 0x256   : > { %1023 = vrot.lane.b32.xlu0 %v957_v56, %s1538_s21 }
 0x2b3   : > { %v1005_v9 = vpop.permute.xlu1 %1004 }
 0x2b4   : > { %v1001_v10 = vpop.permute.xlu0 %1000 }
 0x2b5   : > { %v1008_v25 = vsel %vm1007_vm2, %v1001_v10, %v1005_v9 }
 0x2b6   : > { %v1015_v27 = vmul.f32 %v1014_v55, %v1008_v25 }
 0x2b7   : > { %v1052_v12 = vpop.permute.xlu1 %1051 }
 0x2b8   : > { %v1034_v16 = vpop.permute.xlu0 %1033  ;;  %v1054_v20 = vmul.f32 %v1052_v12, %v966_v1  ;;  %v1055_v21 = vmul.f32 %v1052_v12, %v968_v3 }
 0x2b9   : > { %v1036_v17 = vmul.f32 %v1034_v16, %v962_v60  ;;  %v1037_v18 = vmul.f32 %v1034_v16, %v964_v63 }
 0x2bb   : > { %1040 = vrot.lane.b32.xlu1 %v1036_v17, %s1541_s0  ;;  %1042 = vrot.lane.b32.xlu0 %v1037_v18, %s1541_s0  ;;  %v1085_v22 = vpop.permute.xlu1 %1084 }
 0x2bc   : > { %v1068_v19 = vpop.permute.xlu0 %1067  ;;  %v1088_v28 = vmul.f32 %v1085_v22, %v984_v15  ;;  %v1087_v32 = vmul.f32 %v1085_v22, %v1814_v52 }
 0x2bd   : > { %v1070_v23 = vmul.f32 %v1068_v19, %v976_v6  ;;  %v1071_v53 = vmul.f32 %v1068_v19, %v978_v7 }
 0x2bf   : > { %1058 = vrot.lane.b32.xlu1 %v1054_v20, %s1539_s15  ;;  %1060 = vrot.lane.b32.xlu0 %v1055_v21, %s1539_s15  ;;  %v1118_v26 = vpop.permute.xlu1 %1117 }
 0x2c0   : > { %v1116_v24 = vpop.permute.xlu0 %1115 }
 0x2c1   : > { %v1120_v29 = vsel %vm1119_vm3, %v1116_v24, %v1118_v26 }
 0x2c3   : > { %1074 = vrot.lane.b32.xlu1 %v1070_v23, %s1545_s19  ;;  %1076 = vrot.lane.b32.xlu0 %v1071_v53, %s1545_s19 }
 0x2c4   : > { %v1123_v30 = vpop.permute.xlu0 %1122 }
 0x2c5   : > { %v1125_v31 = vsel %vm1078_vm4, %v1120_v29, %v1123_v30 }
 0x2c6   : > { %v1126_v33 = vmul.f32 %v1125_v31, %v1817_v57 }
 0x2c7   : > { %1017 = vrot.lane.b32.xlu1 %v1015_v27, %s1538_s21  ;;  %1093 = vrot.lane.b32.xlu0 %v1088_v28, %s1546_s27 }
 0x2c8   : > { %v1024_v41 = vpop.permute.xlu0 %1023 }
 0x2cb   : > { %1091 = vrot.lane.b32.xlu1 %v1087_v32, %s1546_s27  ;;  %1103 = vrot.lane.b32.xlu0 %v986_v40, %s1547_s24 }
 0x2cf   : > { %1136 = vperm.xlu1 %1427, %v1133_v34   ;;  %1128 = vrot.lane.b32.xlu0 %v1126_v33, %s1538_s21  ;;  %s1323_s21 = sshll.u32 %s1898_s30, 1 }
 0x2d0   : > { %s497_s26 = sadd.s32 %s1323_s21, %s1684_s23 }
 0x2d1   : > { %s1324_s14 = sshll.u32 %s497_s26, 2 }
 0x2d2   : > { %s499_s0 = scalar_lea.vmem %s1882_s8, %s1324_s14 }
 0x2d3   : > { %1105 = vrot.lane.b32.xlu1 %v1819_v42, %s1547_s24 }
 0x32d   : > { %v1041_v14 = vpop.permute.xlu1 %1040  ;;  %v1043_v37 = vpop.permute.xlu0 %1042 }
 0x32e   : > { %v1045_v62 = vsel %vm1044_vm5, %v1041_v14, %v1043_v37 }
 0x331   : > { %v1059_v35 = vpop.permute.xlu1 %1058  ;;  %v1061_v43 = vpop.permute.xlu0 %1060 }
 0x332   : > { %v1062_v48 = vsel %vm1007_vm2, %v1059_v35, %v1061_v43 }
 0x335   : > { %v1075_v36 = vpop.permute.xlu1 %1074  ;;  %v1077_v45 = vpop.permute.xlu0 %1076 }
 0x336   : > { %v1079_v52 = vsel %vm1078_vm4, %v1075_v36, %v1077_v45 }
 0x339   : > { %v1018_v38 = vpop.permute.xlu1 %1017  ;;  %v1094_v13 = vpop.permute.xlu0 %1093 }
 0x33a   : > { %v1021_v39 = vadd.f32 %v1018_v38, %v974_v5  ;;  %v1020_v44 = vadd.f32 %v1018_v38, %v972_v4 }
 0x33c   : > { %v1027_v54 = vadd.f32 %v1024_v41, %v1021_v39  ;;  %v1026_v11 = vadd.f32 %v1024_v41, %v1020_v44 }
 0x33d   : > { %v1092_v51 = vpop.permute.xlu1 %1091  ;;  %v1104_v56 = vpop.permute.xlu0 %1103 }
 0x33e   : > { %v1049_v46 = vadd.f32 %v1045_v62, %v1027_v54  ;;  %v1048_v47 = vadd.f32 %v1041_v14, %v1026_v11  ;;  %v1096_v40 = vsel %vm1095_vm6, %v1092_v51, %v1094_v13 }
 0x340   : > { %v1066_v49 = vadd.f32 %v1062_v48, %v1049_v46  ;;  %v1065_v50 = vadd.f32 %v1059_v35, %v1048_v47 }
 0x341   : > { %v1129_v61 = vpop.permute.xlu0 %1128 }
 0x342   : > { %v1083_v8 = vadd.f32 %v1077_v45, %v1066_v49  ;;  %v1082_v55 = vadd.f32 %v1079_v52, %v1065_v50 }
 0x344   : > { %v1100_v57 = vadd.f32 %v1094_v13, %v1083_v8  ;;  %v1099_v58 = vadd.f32 %v1096_v40, %v1082_v55 }
 0x34e   : > { %v1137_v15 = vpop.permute.xlu1 %1136 }
 0x352   : > { %v1106_v42 = vpop.permute.xlu1 %1105 }
 0x353   : > { %v1108_v59 = vsel %vm1107_vm7, %v1104_v56, %v1106_v42  ;;  %v1112_v60 = vadd.f32 %v1106_v42, %v1100_v57 }
 0x354   : > { %v1111_v63 = vadd.f32 %v1108_v59, %v1099_v58 }
 0x355   : > { %v1132_v0 = vadd.f32 %v1129_v61, %v1112_v60 }
 0x356   : > { %v1131_v1 = vadd.f32 %v1129_v61, %v1111_v63 }
 0x357   : > { %v1140_v2 = vadd.f32 %v1137_v15, %v1132_v0 }
 0x358   : > { %v1139_v3 = vadd.f32 %v1137_v15, %v1131_v1 }
 0x359   : > { %1145 = vrot.lane.b32.xlu0 %v1140_v2, %s1547_s24 }
 0x35a   : > { %1143 = vrot.lane.b32.xlu1 %v1139_v3, %s1547_s24 }
 0x3cb   : > { %v1146_v4 = vpop.permute.xlu0 %1145 }
 0x3cc   : > { %v1144_v5 = vpop.permute.xlu1 %1143 }
 0x3cd   : > { %v1147_v6 = vsel %vm1107_vm7, %v1144_v5, %v1146_v4 }
 0x3ce   : > { %1149 = vst [vmem:[%s499_s0] sm:$0xf] %v1147_v6 }
 0x3cf PF: > { %s18_s11 = sadd.s32 1, %s1535_s11   ;;  %s1885_s27 = smov %s1515_s28 }
 0x3d0   : > { %p15_p1 = scmp.ge.s32.totalorder %s18_s11, 6   ;;  %s1886_s28 = smov %s1644_s18 }
 0x3d1   : > { %s1887_s29 = smov %s1527_s9  ;;  %s1888_s30 = smov %s1531_s10 }
 0x3d2   : > { %s1889_s9 = smov %s1892_s12  ;;  %s1890_s10 = smov %s1896_s13 }
 0x3d3   :  { %17 = sbr.rel (!%p15_p1) target bundleno = 6 (0x6), region = 137 }

</bundles_post_ra>
